<compile_context>
chip_gen: v7x
topology: tpu7x:2x2x1
jax: 0.10.0
libtpu: 0.0.40
codegen_flags: <defaults>
</compile_context>

<pallas_src>
import functools

import jax
import jax.numpy as jnp
from jax.experimental import pallas as pl
from jax.experimental.pallas import tpu as pltpu

_MM_DTYPE = jnp.bfloat16  # MXU input dtype; accumulation stays f32.


def _update_painn_kernel(
    s_ref,       # (TN, F)        caller dtype (f32/bf16)  node scalar features
    v_ref,       # (3, TN, F)     caller dtype, d-major     node vector features
    wUV_ref,     # (F, 2F)        bf16  [denseU^T | denseV^T]
    wup_ref,     # (2F, F)        bf16  lin_up^T (rows: [s-half ; |V_v|-half])
    bup_ref,     # (1, F)         f32
    w2_ref,      # (F, 3F)        bf16  lin2^T (cols: [vv | sv | ss])
    b2_ref,      # (1, 3F)        f32
    dsu_ref,     # (TN, F)        out_dtype  output
    dvu_ref,     # (3, TN, F)     out_dtype  output, d-major
    *,
    add_residual: bool,
):
    TN, F = s_ref.shape
    s_raw = s_ref[...]                               # caller dtype
    v_raw = v_ref[...]                               # caller dtype, (3, TN, F)

    # Cast to bf16 in-kernel (single HBM read of the caller's arrays).
    s = s_raw.astype(_MM_DTYPE)                      # (TN, F)
    v = v_raw.astype(_MM_DTYPE).reshape(3 * TN, F)   # free reshape (TN % 16 == 0)

    # ---- denseU / denseV fused into one MXU op: (3*TN, F) x (F, 2F) --------
    uv = jnp.dot(v, wUV_ref[...], preferred_element_type=jnp.float32)
    uv = uv.reshape(3, TN, 2 * F)
    u_v = uv[:, :, :F]                               # (3, TN, F) f32
    v_v = uv[:, :, F:]                               # (3, TN, F) f32

    uv_dot = jnp.sum(u_v * v_v, axis=0)              # einsum('ijk,ijk->ij')
    v_norm = jnp.sqrt(jnp.sum(v_v * v_v, axis=0))    # torch.norm(V_v, dim=-1)

    # ---- lin_up on lane-concat [s, ||V_v||] : (TN, 2F) x (2F, F) ------------
    # (K=2F=256 exactly fills the v6e/v7x MXU; MXU has slack anyway — HBM-bound.)
    a_in = jnp.concatenate([s, v_norm.astype(_MM_DTYPE)], axis=-1)
    a1 = jnp.dot(a_in, wup_ref[...], preferred_element_type=jnp.float32)
    a1 = a1 + bup_ref[...]
    a1 = a1 * jax.nn.sigmoid(a1)                     # SiLU, f32 (VPU + EUP)

    # ---- lin2 fused: (TN, F) x (F, 3F), lane-split into vv/sv/ss ------------
    a2 = jnp.dot(a1.astype(_MM_DTYPE), w2_ref[...],
                 preferred_element_type=jnp.float32) + b2_ref[...]
    a_vv = a2[:, :F]
    a_sv = a2[:, F:2 * F]
    a_ss = a2[:, 2 * F:]

    dsu = a_ss + a_sv * uv_dot                       # (TN, F)    f32
    dvu = u_v * a_vv[None, :, :]                     # (3, TN, F) f32

    if add_residual:
        # Fused PaiNN residual update: emit s+ds / v+dv (saves a full
        # elementwise HBM pass downstream). f32 add, free VPU work under DMA.
        dsu = dsu + s_raw.astype(jnp.float32)
        dvu = dvu + v_raw.astype(jnp.float32)

    dsu_ref[...] = dsu.astype(dsu_ref.dtype)
    dvu_ref[...] = dvu.astype(dvu_ref.dtype)


def _full_spec(shape):
    nd = len(shape)
    return pl.BlockSpec(shape, lambda i, _nd=nd: (0,) * _nd)


def _choose_node_tile(N, node_tile, min_steps=4):
    """Pick the node tile: as large as requested (amortizes ~0.35us/step grid
    overhead; 512-1024 rows reaches 85%+ of HBM roofline), but keep >= min_steps
    grid steps when N allows so BlockSpec double-buffering can hide HBM latency
    and v7x's two TensorCores both get work. Cap node_tile at 1024 on v7x
    (64 MiB physical VMEM)."""
    tn = min(node_tile, N)
    if N // min_steps >= 64:             # only shrink when tiles stay >= 64 rows
        tn = min(tn, N // min_steps)
    if tn < N:
        tn = max(16, (tn // 16) * 16)    # bf16 sublane packing (16 rows / vreg)
    return tn


@functools.partial(jax.jit,
                   static_argnames=("node_tile", "out_dtype", "add_residual"))
def update_painn(s, v_dmajor, params, *, node_tile=1024,
                 out_dtype=jnp.bfloat16, add_residual=False):
    """PaiNN update block.

    s:        (N, F)      scalar node features (f32 or bf16; cast in-kernel)
    v_dmajor: (3, N, F)   vector node features, d-major (canonical TPU layout)
    returns   (dsu (N, F), dvu (3, N, F)) in out_dtype; if add_residual=True the
              outputs are s+dsu / v+dvu instead of the raw deltas.
    """
    N, F = s.shape

    # Weights: bf16 MXU inputs, f32 biases. Small relative to node data.
    wUV = jnp.concatenate([params["wU_t"], params["wV_t"]],
                          axis=1).astype(_MM_DTYPE)                      # (F, 2F)
    wup = jnp.concatenate([params["wup_s_t"], params["wup_n_t"]],
                          axis=0).astype(_MM_DTYPE)                      # (2F, F)
    w2 = jnp.concatenate([params["w2_vv_t"], params["w2_sv_t"],
                          params["w2_ss_t"]], axis=1).astype(_MM_DTYPE)  # (F, 3F)
    bup = params["bup"].astype(jnp.float32)                              # (1, F)
    b2 = jnp.concatenate([params["b_vv"], params["b_sv"], params["b_ss"]],
                         axis=1).astype(jnp.float32)                     # (1, 3F)

    tn = _choose_node_tile(N, node_tile)
    grid = (pl.cdiv(N, tn),)
    # Note: if N % tn != 0 the last tile computes on block padding; this is safe
    # because every row is independent and padded output rows are discarded.

    kernel = functools.partial(_update_painn_kernel, add_residual=add_residual)

    dsu, dvu = pl.pallas_call(
        kernel,
        grid=grid,
        in_specs=[
            pl.BlockSpec((tn, F), lambda i: (i, 0)),         # s tile
            pl.BlockSpec((3, tn, F), lambda i: (0, i, 0)),   # v tile (d-major)
            _full_spec(wUV.shape),                           # weights stay
            _full_spec(wup.shape),                           #   VMEM-resident
            _full_spec(bup.shape),                           #   across tiles
            _full_spec(w2.shape),
            _full_spec(b2.shape),
        ],
        out_specs=(
            pl.BlockSpec((tn, F), lambda i: (i, 0)),
            pl.BlockSpec((3, tn, F), lambda i: (0, i, 0)),
        ),
        out_shape=(
            jax.ShapeDtypeStruct((N, F), out_dtype),
            jax.ShapeDtypeStruct((3, N, F), out_dtype),
        ),
        compiler_params=pltpu.CompilerParams(
            dimension_semantics=("parallel",),
            # ~13-15 MiB at tn=1024; keep <= ~48 MiB if sweeping larger tiles
            # on v7x (64 MiB physical VMEM), <= 64 MiB on v5e/v6e.
            vmem_limit_bytes=32 * 1024 * 1024,
        ),
    )(s, v_dmajor, wUV, wup, bup, w2, b2)
    return dsu, dvu


def update_painn_nf3(s, v_nf3, params, **kwargs):
    """Compatibility adapter for the PyTorch (N, F, 3) layout.

    Each transpose here reads+writes the full v tensor in HBM and costs more
    than the kernel itself — keep v d-major (3, N, F) end-to-end in the model
    and call update_painn directly in the hot path.
    """
    v_dmajor = jnp.transpose(v_nf3, (2, 0, 1))
    dsu, dvu = update_painn(s, v_dmajor, params, **kwargs)
    return dsu, jnp.transpose(dvu, (1, 2, 0))


def _init_params(key, num_feat):
    """Deterministic synthetic weights in kernel (pre-transposed) layout."""
    ks = jax.random.split(key, 10)
    F = num_feat
    sc1 = 1.0 / jnp.sqrt(F)
    sc2 = 1.0 / jnp.sqrt(2.0 * F)
    return {
        "wU_t":    jax.random.normal(ks[0], (F, F), jnp.float32) * sc1,
        "wV_t":    jax.random.normal(ks[1], (F, F), jnp.float32) * sc1,
        "wup_s_t": jax.random.normal(ks[2], (F, F), jnp.float32) * sc2,
        "wup_n_t": jax.random.normal(ks[3], (F, F), jnp.float32) * sc2,
        "bup":     jax.random.normal(ks[4], (1, F), jnp.float32) * 0.01,
        "w2_vv_t": jax.random.normal(ks[5], (F, F), jnp.float32) * sc1,
        "w2_sv_t": jax.random.normal(ks[6], (F, F), jnp.float32) * sc1,
        "w2_ss_t": jax.random.normal(ks[7], (F, F), jnp.float32) * sc1,
        "b_vv":    jax.random.normal(ks[8], (1, F), jnp.float32) * 0.01,
        "b_sv":    jax.random.normal(ks[9], (1, F), jnp.float32) * 0.01,
        "b_ss":    jnp.zeros((1, F), jnp.float32),
    }


def _reference(s, v_dmajor, params, matmul_dtype=jnp.float32):
    """Pure-JAX transcription of the PyTorch forward.

    matmul_dtype=bf16 mirrors the kernel's casting points (bf16 matmul inputs,
    f32 accumulation/elementwise) for a tight numerical comparison;
    matmul_dtype=f32 is the faithful full-precision reference.
    """
    md = matmul_dtype
    f32 = jnp.float32
    F = s.shape[1]
    wUV = jnp.concatenate([params["wU_t"], params["wV_t"]], axis=1).astype(md)
    wup = jnp.concatenate([params["wup_s_t"], params["wup_n_t"]], axis=0).astype(md)
    w2 = jnp.concatenate([params["w2_vv_t"], params["w2_sv_t"],
                          params["w2_ss_t"]], axis=1).astype(md)
    b2 = jnp.concatenate([params["b_vv"], params["b_sv"], params["b_ss"]], axis=1)

    v = v_dmajor.astype(md)                                   # (3, N, F)
    uv = jnp.einsum("dnf,fg->dng", v, wUV, preferred_element_type=f32)
    U_v, V_v = uv[..., :F], uv[..., F:]
    uv_dot = jnp.sum(U_v * V_v, axis=0)
    v_norm = jnp.sqrt(jnp.sum(V_v * V_v, axis=0))
    a_in = jnp.concatenate([s.astype(md), v_norm.astype(md)], axis=-1)
    a1 = jnp.dot(a_in, wup, preferred_element_type=f32) + params["bup"]
    a1 = a1 * jax.nn.sigmoid(a1)
    a2 = jnp.dot(a1.astype(md), w2, preferred_element_type=f32) + b2
    a_vv, a_sv, a_ss = a2[:, :F], a2[:, F:2 * F], a2[:, 2 * F:]
    dsu = a_ss + a_sv * uv_dot
    dvu = U_v * a_vv[None, :, :]
    return dsu, dvu


def _rel_err(a, b):
    a = a.astype(jnp.float32)
    b = b.astype(jnp.float32)
    return jnp.linalg.norm((a - b).ravel()) / (jnp.linalg.norm(b.ravel()) + 1e-12)


if __name__ == "__main__":
    num_feat = 128    # lane-dense (multiple of 128)
    num_nodes = 512   # tile chooser -> tn=128, 4 grid steps (pipelined)

    key = jax.random.PRNGKey(0)
    k_s, k_v, k_p = jax.random.split(key, 3)
    s = jax.random.normal(k_s, (num_nodes, num_feat), jnp.float32)
    v_dmajor = jax.random.normal(k_v, (3, num_nodes, num_feat), jnp.float32)
    params = _init_params(k_p, num_feat)

    # --- default path: bf16 outputs, raw deltas ------------------------------
    dsu, dvu = update_painn(s, v_dmajor, params)
    jax.block_until_ready((dsu, dvu))
    assert dsu.shape == (num_nodes, num_feat) and dsu.dtype == jnp.bfloat16
    assert dvu.shape == (3, num_nodes, num_feat) and dvu.dtype == jnp.bfloat16
    dsu32 = dsu.astype(jnp.float32)
    dvu32 = dvu.astype(jnp.float32)

    # Precision-matched reference (bf16 matmul inputs, f32 accumulation),
    # rounded to the kernel's output dtype.
    dsu_bf, dvu_bf = _reference(s, v_dmajor, params, matmul_dtype=jnp.bfloat16)
    dsu_bf_r = dsu_bf.astype(jnp.bfloat16).astype(jnp.float32)
    dvu_bf_r = dvu_bf.astype(jnp.bfloat16).astype(jnp.float32)
    assert jnp.allclose(dsu32, dsu_bf_r, rtol=2e-2, atol=2e-2)
    assert jnp.allclose(dvu32, dvu_bf_r, rtol=2e-2, atol=2e-2)

    # Full-f32 reference (faithful to the PyTorch module): global error check.
    dsu_f32, dvu_f32 = _reference(s, v_dmajor, params, matmul_dtype=jnp.float32)
    assert _rel_err(dsu32, dsu_f32) < 4e-2
    assert _rel_err(dvu32, dvu_f32) < 4e-2

    # --- f32 outputs + fused residual path ------------------------------------
    dsu_d, dvu_d = update_painn(s, v_dmajor, params, out_dtype=jnp.float32)
    dsu_r, dvu_r = update_painn(s, v_dmajor, params, out_dtype=jnp.float32,
                                add_residual=True)
    jax.block_until_ready((dsu_r, dvu_r))
    assert jnp.allclose(dsu_r, s + dsu_d, rtol=1e-5, atol=1e-5)
    assert jnp.allclose(dvu_r, v_dmajor + dvu_d, rtol=1e-5, atol=1e-5)

    # --- PyTorch-layout adapter stays consistent with the d-major path -------
    dsu2, dvu_nf3 = update_painn_nf3(s, jnp.transpose(v_dmajor, (1, 2, 0)), params)
    jax.block_until_ready((dsu2, dvu_nf3))
    assert jnp.allclose(dsu2.astype(jnp.float32), dsu32, rtol=1e-5, atol=1e-5)
    assert jnp.allclose(jnp.transpose(dvu_nf3, (2, 0, 1)).astype(jnp.float32),
                        dvu32, rtol=1e-5, atol=1e-5)

    print("KERNEL_OK")
</pallas_src>

<mosaic_0001>
module attributes {stable_mosaic.version = 11 : i64} {
  func.func @_update_painn_kernel(%arg0: i32, %arg1: memref<128x128xf32, #tpu.memory_space<vmem>>, %arg2: memref<3x128x128xf32, #tpu.memory_space<vmem>>, %arg3: memref<128x256xbf16, #tpu.memory_space<vmem>>, %arg4: memref<256x128xbf16, #tpu.memory_space<vmem>>, %arg5: memref<1x128xf32, #tpu.memory_space<vmem>>, %arg6: memref<128x384xbf16, #tpu.memory_space<vmem>>, %arg7: memref<1x384xf32, #tpu.memory_space<vmem>>, %arg8: memref<128x128xbf16, #tpu.memory_space<vmem>>, %arg9: memref<3x128x128xbf16, #tpu.memory_space<vmem>>) attributes {dimension_semantics = [#tpu.dimension_semantics<parallel>], iteration_bounds = array<i64: 4>, scalar_prefetch = 0 : i64, scratch_operands = 0 : i64, tpu.core_type = #tpu.core_type<tc>, window_params = [{transform_indices = @transform_0, window_bounds = array<i64: 128, 128>}, {transform_indices = @transform_1, window_bounds = array<i64: 3, 128, 128>}, {pipeline_mode = #tpu.pipeline_mode<synchronous>, transform_indices = @transform_2, window_bounds = array<i64: 128, 256>}, {pipeline_mode = #tpu.pipeline_mode<synchronous>, transform_indices = @transform_3, window_bounds = array<i64: 256, 128>}, {pipeline_mode = #tpu.pipeline_mode<synchronous>, transform_indices = @transform_4, window_bounds = array<i64: 1, 128>}, {pipeline_mode = #tpu.pipeline_mode<synchronous>, transform_indices = @transform_5, window_bounds = array<i64: 128, 384>}, {pipeline_mode = #tpu.pipeline_mode<synchronous>, transform_indices = @transform_6, window_bounds = array<i64: 1, 384>}, {transform_indices = @transform_7, window_bounds = array<i64: 128, 128>}, {transform_indices = @transform_8, window_bounds = array<i64: 3, 128, 128>}]} {
    %c0 = arith.constant 0 : index
    %c0_0 = arith.constant 0 : index
    %0 = vector.load %arg1[%c0, %c0_0] : memref<128x128xf32, #tpu.memory_space<vmem>>, vector<128x128xf32>
    %c0_1 = arith.constant 0 : index
    %c0_2 = arith.constant 0 : index
    %c0_3 = arith.constant 0 : index
    %1 = vector.load %arg2[%c0_1, %c0_2, %c0_3] : memref<3x128x128xf32, #tpu.memory_space<vmem>>, vector<3x128x128xf32>
    %2 = arith.truncf %0 : vector<128x128xf32> to vector<128x128xbf16>
    %3 = arith.truncf %1 : vector<3x128x128xf32> to vector<3x128x128xbf16>
    %4 = vector.shape_cast %3 : vector<3x128x128xbf16> to vector<384x128xbf16>
    %c0_4 = arith.constant 0 : index
    %c0_5 = arith.constant 0 : index
    %5 = vector.load %arg3[%c0_4, %c0_5] : memref<128x256xbf16, #tpu.memory_space<vmem>>, vector<128x256xbf16>
    %cst = arith.constant dense<0.000000e+00> : vector<384x256xf32>
    %6 = tpu.matmul %4, %5, %cst {dimension_numbers = #tpu.dot_dimension_numbers<[1], [0], [0], [1], [0, 0, 1, 1], [], []>} : vector<384x128xbf16>, vector<128x256xbf16>, vector<384x256xf32> -> vector<384x256xf32>
    %7 = vector.shape_cast %6 : vector<384x256xf32> to vector<3x128x256xf32>
    %8 = vector.extract_strided_slice %7 {offsets = [0, 0, 0], sizes = [3, 128, 128], strides = [1, 1, 1]} : vector<3x128x256xf32> to vector<3x128x128xf32>
    %9 = vector.extract_strided_slice %7 {offsets = [0, 0, 128], sizes = [3, 128, 128], strides = [1, 1, 1]} : vector<3x128x256xf32> to vector<3x128x128xf32>
    %10 = arith.mulf %8, %9 : vector<3x128x128xf32>
    %cst_6 = arith.constant dense<0.000000e+00> : vector<128x128xf32>
    %11 = vector.multi_reduction <add>, %10, %cst_6 [0] : vector<3x128x128xf32> to vector<128x128xf32>
    %12 = arith.mulf %9, %9 : vector<3x128x128xf32>
    %cst_7 = arith.constant dense<0.000000e+00> : vector<128x128xf32>
    %13 = vector.multi_reduction <add>, %12, %cst_7 [0] : vector<3x128x128xf32> to vector<128x128xf32>
    %14 = math.sqrt %13 : vector<128x128xf32>
    %15 = arith.truncf %14 : vector<128x128xf32> to vector<128x128xbf16>
    %16 = tpu.concatenate %2, %15 in 1 : vector<128x128xbf16>, vector<128x128xbf16> -> vector<128x256xbf16>
    %c0_8 = arith.constant 0 : index
    %c0_9 = arith.constant 0 : index
    %17 = vector.load %arg4[%c0_8, %c0_9] : memref<256x128xbf16, #tpu.memory_space<vmem>>, vector<256x128xbf16>
    %cst_10 = arith.constant dense<0.000000e+00> : vector<128x128xf32>
    %18 = tpu.matmul %16, %17, %cst_10 {dimension_numbers = #tpu.dot_dimension_numbers<[1], [0], [0], [1], [0, 0, 1, 1], [], []>} : vector<128x256xbf16>, vector<256x128xbf16>, vector<128x128xf32> -> vector<128x128xf32>
    %c0_11 = arith.constant 0 : index
    %c0_12 = arith.constant 0 : index
    %19 = vector.load %arg5[%c0_11, %c0_12] : memref<1x128xf32, #tpu.memory_space<vmem>>, vector<1x128xf32>
    %20 = vector.broadcast %19 : vector<1x128xf32> to vector<128x128xf32>
    %21 = arith.addf %18, %20 : vector<128x128xf32>
    %22 = arith.negf %21 : vector<128x128xf32>
    %23 = math.exp %22 : vector<128x128xf32>
    %cst_13 = arith.constant 1.000000e+00 : f32
    %24 = vector.broadcast %cst_13 : f32 to vector<128x128xf32>
    %25 = arith.addf %24, %23 : vector<128x128xf32>
    %26 = arith.divf %24, %25 : vector<128x128xf32>
    %27 = arith.mulf %21, %26 : vector<128x128xf32>
    %28 = arith.truncf %27 : vector<128x128xf32> to vector<128x128xbf16>
    %c0_14 = arith.constant 0 : index
    %c0_15 = arith.constant 0 : index
    %29 = vector.load %arg6[%c0_14, %c0_15] : memref<128x384xbf16, #tpu.memory_space<vmem>>, vector<128x384xbf16>
    %cst_16 = arith.constant dense<0.000000e+00> : vector<128x384xf32>
    %30 = tpu.matmul %28, %29, %cst_16 {dimension_numbers = #tpu.dot_dimension_numbers<[1], [0], [0], [1], [0, 0, 1, 1], [], []>} : vector<128x128xbf16>, vector<128x384xbf16>, vector<128x384xf32> -> vector<128x384xf32>
    %c0_17 = arith.constant 0 : index
    %c0_18 = arith.constant 0 : index
    %31 = vector.load %arg7[%c0_17, %c0_18] : memref<1x384xf32, #tpu.memory_space<vmem>>, vector<1x384xf32>
    %32 = vector.broadcast %31 : vector<1x384xf32> to vector<128x384xf32>
    %33 = arith.addf %30, %32 : vector<128x384xf32>
    %34 = vector.extract_strided_slice %33 {offsets = [0, 0], sizes = [128, 128], strides = [1, 1]} : vector<128x384xf32> to vector<128x128xf32>
    %35 = vector.extract_strided_slice %33 {offsets = [0, 128], sizes = [128, 128], strides = [1, 1]} : vector<128x384xf32> to vector<128x128xf32>
    %36 = vector.extract_strided_slice %33 {offsets = [0, 256], sizes = [128, 128], strides = [1, 1]} : vector<128x384xf32> to vector<128x128xf32>
    %37 = arith.mulf %35, %11 : vector<128x128xf32>
    %38 = arith.addf %36, %37 : vector<128x128xf32>
    %39 = vector.shape_cast %34 : vector<128x128xf32> to vector<1x128x128xf32>
    %40 = vector.broadcast %39 : vector<1x128x128xf32> to vector<3x128x128xf32>
    %41 = arith.mulf %8, %40 : vector<3x128x128xf32>
    %42 = arith.truncf %38 : vector<128x128xf32> to vector<128x128xbf16>
    %c0_19 = arith.constant 0 : index
    %c0_20 = arith.constant 0 : index
    %43 = vector.load %arg8[%c0_19, %c0_20] : memref<128x128xbf16, #tpu.memory_space<vmem>>, vector<128x128xbf16>
    tpu.vector_store %arg8[%c0_19, %c0_20], %42 {strides = array<i32>} : memref<128x128xbf16, #tpu.memory_space<vmem>>, vector<128x128xbf16>,
    %44 = arith.truncf %41 : vector<3x128x128xf32> to vector<3x128x128xbf16>
    %c0_21 = arith.constant 0 : index
    %c0_22 = arith.constant 0 : index
    %c0_23 = arith.constant 0 : index
    %45 = vector.load %arg9[%c0_21, %c0_22, %c0_23] : memref<3x128x128xbf16, #tpu.memory_space<vmem>>, vector<3x128x128xbf16>
    tpu.vector_store %arg9[%c0_21, %c0_22, %c0_23], %44 {strides = array<i32>} : memref<3x128x128xbf16, #tpu.memory_space<vmem>>, vector<3x128x128xbf16>,
    return
  }
  func.func @transform_0(%arg0: i32) -> (i32, i32) {
    %c0_i32 = arith.constant 0 : i32
    %c0_i32_0 = arith.constant 0 : i32
    return %arg0, %c0_i32 : i32, i32
  }
  func.func @transform_1(%arg0: i32) -> (i32, i32, i32) {
    %c0_i32 = arith.constant 0 : i32
    %c0_i32_0 = arith.constant 0 : i32
    %c0_i32_1 = arith.constant 0 : i32
    return %c0_i32, %arg0, %c0_i32_0 : i32, i32, i32
  }
  func.func @transform_2(%arg0: i32) -> (i32, i32) {
    %c0_i32 = arith.constant 0 : i32
    %c0_i32_0 = arith.constant 0 : i32
    %c0_i32_1 = arith.constant 0 : i32
    return %c0_i32, %c0_i32_0 : i32, i32
  }
  func.func @transform_3(%arg0: i32) -> (i32, i32) {
    %c0_i32 = arith.constant 0 : i32
    %c0_i32_0 = arith.constant 0 : i32
    %c0_i32_1 = arith.constant 0 : i32
    return %c0_i32, %c0_i32_0 : i32, i32
  }
  func.func @transform_4(%arg0: i32) -> (i32, i32) {
    %c0_i32 = arith.constant 0 : i32
    %c0_i32_0 = arith.constant 0 : i32
    %c0_i32_1 = arith.constant 0 : i32
    return %c0_i32, %c0_i32_0 : i32, i32
  }
  func.func @transform_5(%arg0: i32) -> (i32, i32) {
    %c0_i32 = arith.constant 0 : i32
    %c0_i32_0 = arith.constant 0 : i32
    %c0_i32_1 = arith.constant 0 : i32
    return %c0_i32, %c0_i32_0 : i32, i32
  }
  func.func @transform_6(%arg0: i32) -> (i32, i32) {
    %c0_i32 = arith.constant 0 : i32
    %c0_i32_0 = arith.constant 0 : i32
    %c0_i32_1 = arith.constant 0 : i32
    return %c0_i32, %c0_i32_0 : i32, i32
  }
  func.func @transform_7(%arg0: i32) -> (i32, i32) {
    %c0_i32 = arith.constant 0 : i32
    %c0_i32_0 = arith.constant 0 : i32
    return %arg0, %c0_i32 : i32, i32
  }
  func.func @transform_8(%arg0: i32) -> (i32, i32, i32) {
    %c0_i32 = arith.constant 0 : i32
    %c0_i32_0 = arith.constant 0 : i32
    %c0_i32_1 = arith.constant 0 : i32
    return %c0_i32, %arg0, %c0_i32_0 : i32, i32, i32
  }
}

</mosaic_0001>

<bundles_post_ra>
// kernel: update_painn.1
= control target key start
LH: loop header
LB: loop body
LE: loop exit
PB: predicated region body
PF: predicated region fallthrough
CT: control target
= control target key end

     0   :  { %s4789_s0 = inlined_call_operand.vmem [shape: f32[512,128], index: 0, kind: input, shape index: {}]   ;;  %s4790_s1 = inlined_call_operand.vmem [shape: f32[3,512,128], index: 1, kind: input, shape index: {}]   ;;  %s4791_s2 = inlined_call_operand.vmem [shape: bf16[128,256], index: 2, kind: input, shape index: {}]   ;;  %s4792_s3 = inlined_call_operand.vmem [shape: bf16[256,128], index: 3, kind: input, shape index: {}]   ;;  %s4793_s4 = inlined_call_operand.vmem [shape: f32[1,128], index: 4, kind: input, shape index: {}]   ;;  %s4794_s5 = inlined_call_operand.vmem [shape: bf16[128,384], index: 5, kind: input, shape index: {}]   ;;  %s4795_s6 = inlined_call_operand.vmem [shape: f32[1,384], index: 6, kind: input, shape index: {}]   ;;  %s4796_s7 = inlined_call_operand.hbm [shape: bf16[512,128], index: 7, kind: output, shape index: {0}]   ;;  %s4797_s8 = inlined_call_operand.hbm [shape: bf16[3,512,128], index: 8, kind: output, shape index: {1}]  }
   0x1   :  { %4829 = sst [smem:[#allocation43_spill]] %s4789_s0 }
   0x2   :  { %14 = vsyncpa [#allocation4], 0 }
   0x3   :  { %16 = vsyncpa [#allocation4 + $0x1], 0 }
   0x4   :  { %17 = vsyncpa [#allocation6], 0 }
   0x5   :  { %19 = vsyncpa [#allocation6 + $0x1], 0  ;;  %s3501_s27 = smov 0   ;;  %s3503_s28 = smov 0  }
   0x6   :  { %s3505_s29 = smov 0   ;;  %s3507_s30 = smov 0  }
   0x7 LB: > { %s3522_s9 = sadd.s32 4294967295, %s3443_s30   ;;  %s2624_s10 = sadd.s32 4294967294, %s3443_s30   ;;  %s3443_s30 = sphi %s3507_s30, %s4902_s30   ;;  %s3439_s29 = sphi %s3505_s29, %s4901_s29   ;;  %s3435_s28 = sphi %s3503_s28, %s4900_s28   ;;  %s3431_s27 = sphi %s3501_s27, %s4899_s27  }
   0x8   : > { %s3526_s11 = sadd.s32 1, %s3443_s30   ;;  %s58_s12 = sadd.s32 1, %s3439_s29 }
   0x9   : > { %s55_s13 = ssub.s32 %s3443_s30, %s3526_s11  ;;  %p65_p0 = scmp.ne.s32.totalorder %s3439_s29, %s3435_s28 }
   0xa   : > { %p56_p1 = scmp.eq.s32.totalorder %s55_s13, 0  ;;  %p66_p2 = scmp.eq.s32.totalorder %s3443_s30, 0 }
   0xb   : > { %p200_p3 = scmp.eq.s32.totalorder %s3522_s9, 3  ;;  %p205_p4 = scmp.ne.s32.totalorder %s3435_s28, %s3431_s27 }
   0xc   : > { %s3538_s14 = scalar_select %p56_p1, %s3439_s29, %s58_s12  }
   0xd   : > { %p67_p5 = por %p66_p2, %p65_p0  ;;  %p3540_p6 = por %p200_p3, %p65_p0 }
   0xe   : > { %p206_p7 = scmp.eq.s32.totalorder %s2624_s10, 3  ;;  %p2626_p9 = scmp.ge.s32.totalorder %s3443_s30, 4 }
  0x10   : > { %p3544_p8 = por %p206_p7, %p205_p4  ;;  %263 = sbr.rel (%p2626_p9) target bundleno = 52 (0x34), region = 36 }
  0x17   : > { %275 = sbr.rel (!%p67_p5) target bundleno = 52 (0x34), region = 44  ;;  %s277_s17 = sand.u32 (%p67_p5), 1, %s3439_s29  }
  0x18   : > { %s2777_s18 = sshll.u32 (%p67_p5), %s3443_s30, 7  ;;  %s3146_s19 = smul.u32 (%p67_p5), 384, %s277_s17 }
  0x19   : > { %s3554_s22 = scalar_lea.vmem (%p67_p5), %s4790_s1, %s2777_s18 }
  0x1a   : > { %v404_v0 = vld [vmem:[%s3554_s22] sm:$0xff] (%p67_p5)  ;;  %v406_v1 = vld [vmem:[%s3554_s22 + $0x8] sm:$0xff] (%p67_p5)  ;;  %v408_v2 = vld [vmem:[%s3554_s22 + $0x10] sm:$0xff] (%p67_p5)  ;;  %s3562_s23 = scalar_lea.vmem (%p67_p5), [#allocation2], %s3146_s19 }
  0x1b   : > { %v410_v3 = vld [vmem:[%s3554_s22 + $0x18] sm:$0xff] (%p67_p5)  ;;  %v412_v4 = vld [vmem:[%s3554_s22 + $0x20] sm:$0xff] (%p67_p5)  ;;  %v414_v5 = vld [vmem:[%s3554_s22 + $0x28] sm:$0xff] (%p67_p5)  ;;  %405 = vst [vmem:[%s3562_s23] sm:$0xff] (%p67_p5), %v404_v0 }
  0x1c   : > { %407 = vst [vmem:[%s3562_s23 + $0x8] sm:$0xff] (%p67_p5), %v406_v1  ;;  %409 = vst [vmem:[%s3562_s23 + $0x10] sm:$0xff] (%p67_p5), %v408_v2  ;;  %v416_v6 = vld [vmem:[%s3554_s22 + $0x30] sm:$0xff] (%p67_p5)  ;;  %v418_v7 = vld [vmem:[%s3554_s22 + $0x38] sm:$0xff] (%p67_p5) }
  0x1d   : > { %411 = vst [vmem:[%s3562_s23 + $0x18] sm:$0xff] (%p67_p5), %v410_v3  ;;  %413 = vst [vmem:[%s3562_s23 + $0x20] sm:$0xff] (%p67_p5), %v412_v4  ;;  %v420_v8 = vld [vmem:[%s3554_s22 + $0x40] sm:$0xff] (%p67_p5)  ;;  %v422_v9 = vld [vmem:[%s3554_s22 + $0x48] sm:$0xff] (%p67_p5) }
  0x1e   : > { %415 = vst [vmem:[%s3562_s23 + $0x28] sm:$0xff] %v414_v5  ;;  %417 = vst [vmem:[%s3562_s23 + $0x30] sm:$0xff] %v416_v6  ;;  %v424_v10 = vld [vmem:[%s3554_s22 + $0x50] sm:$0xff]  ;;  %v426_v11 = vld [vmem:[%s3554_s22 + $0x58] sm:$0xff] }
  0x1f   : > { %419 = vst [vmem:[%s3562_s23 + $0x38] sm:$0xff] %v418_v7  ;;  %421 = vst [vmem:[%s3562_s23 + $0x40] sm:$0xff] %v420_v8  ;;  %v428_v12 = vld [vmem:[%s3554_s22 + $0x60] sm:$0xff]  ;;  %v430_v13 = vld [vmem:[%s3554_s22 + $0x68] sm:$0xff] }
  0x20   : > { %423 = vst [vmem:[%s3562_s23 + $0x48] sm:$0xff] %v422_v9  ;;  %425 = vst [vmem:[%s3562_s23 + $0x50] sm:$0xff] %v424_v10  ;;  %v432_v14 = vld [vmem:[%s3554_s22 + $0x70] sm:$0xff]  ;;  %v434_v15 = vld [vmem:[%s3554_s22 + $0x78] sm:$0xff] }
  0x21   : > { %427 = vst [vmem:[%s3562_s23 + $0x58] sm:$0xff] %v426_v11  ;;  %429 = vst [vmem:[%s3562_s23 + $0x60] sm:$0xff] %v428_v12  ;;  %v436_v16 = vld [vmem:[%s3554_s22 + $0x200] sm:$0xff]  ;;  %v438_v17 = vld [vmem:[%s3554_s22 + $0x208] sm:$0xff] }
  0x22   : > { %431 = vst [vmem:[%s3562_s23 + $0x68] sm:$0xff] %v430_v13  ;;  %433 = vst [vmem:[%s3562_s23 + $0x70] sm:$0xff] %v432_v14  ;;  %v440_v18 = vld [vmem:[%s3554_s22 + $0x210] sm:$0xff]  ;;  %v442_v19 = vld [vmem:[%s3554_s22 + $0x218] sm:$0xff] }
  0x23   : > { %435 = vst [vmem:[%s3562_s23 + $0x78] sm:$0xff] %v434_v15  ;;  %437 = vst [vmem:[%s3562_s23 + $0x80] sm:$0xff] %v436_v16  ;;  %v444_v20 = vld [vmem:[%s3554_s22 + $0x220] sm:$0xff]  ;;  %v446_v21 = vld [vmem:[%s3554_s22 + $0x228] sm:$0xff] }
  0x24   : > { %439 = vst [vmem:[%s3562_s23 + $0x88] sm:$0xff] %v438_v17  ;;  %441 = vst [vmem:[%s3562_s23 + $0x90] sm:$0xff] %v440_v18  ;;  %v448_v22 = vld [vmem:[%s3554_s22 + $0x230] sm:$0xff]  ;;  %v450_v23 = vld [vmem:[%s3554_s22 + $0x238] sm:$0xff] }
  0x25   : > { %443 = vst [vmem:[%s3562_s23 + $0x98] sm:$0xff] %v442_v19  ;;  %445 = vst [vmem:[%s3562_s23 + $0xa0] sm:$0xff] %v444_v20  ;;  %v452_v24 = vld [vmem:[%s3554_s22 + $0x240] sm:$0xff]  ;;  %v454_v25 = vld [vmem:[%s3554_s22 + $0x248] sm:$0xff] }
  0x26   : > { %447 = vst [vmem:[%s3562_s23 + $0xa8] sm:$0xff] %v446_v21  ;;  %449 = vst [vmem:[%s3562_s23 + $0xb0] sm:$0xff] %v448_v22  ;;  %v456_v26 = vld [vmem:[%s3554_s22 + $0x250] sm:$0xff]  ;;  %v458_v27 = vld [vmem:[%s3554_s22 + $0x258] sm:$0xff] }
  0x27   : > { %451 = vst [vmem:[%s3562_s23 + $0xb8] sm:$0xff] %v450_v23  ;;  %453 = vst [vmem:[%s3562_s23 + $0xc0] sm:$0xff] %v452_v24  ;;  %v460_v28 = vld [vmem:[%s3554_s22 + $0x260] sm:$0xff]  ;;  %v462_v29 = vld [vmem:[%s3554_s22 + $0x268] sm:$0xff] }
  0x28   : > { %455 = vst [vmem:[%s3562_s23 + $0xc8] sm:$0xff] %v454_v25  ;;  %457 = vst [vmem:[%s3562_s23 + $0xd0] sm:$0xff] %v456_v26  ;;  %v464_v30 = vld [vmem:[%s3554_s22 + $0x270] sm:$0xff]  ;;  %v466_v31 = vld [vmem:[%s3554_s22 + $0x278] sm:$0xff] }
  0x29   : > { %459 = vst [vmem:[%s3562_s23 + $0xd8] sm:$0xff] %v458_v27  ;;  %461 = vst [vmem:[%s3562_s23 + $0xe0] sm:$0xff] %v460_v28  ;;  %v468_v32 = vld [vmem:[%s3554_s22 + $0x400] sm:$0xff]  ;;  %v470_v33 = vld [vmem:[%s3554_s22 + $0x408] sm:$0xff] }
  0x2a   : > { %463 = vst [vmem:[%s3562_s23 + $0xe8] sm:$0xff] %v462_v29  ;;  %465 = vst [vmem:[%s3562_s23 + $0xf0] sm:$0xff] %v464_v30  ;;  %v472_v34 = vld [vmem:[%s3554_s22 + $0x410] sm:$0xff]  ;;  %v474_v35 = vld [vmem:[%s3554_s22 + $0x418] sm:$0xff] }
  0x2b   : > { %467 = vst [vmem:[%s3562_s23 + $0xf8] sm:$0xff] %v466_v31  ;;  %469 = vst [vmem:[%s3562_s23 + $0x100] sm:$0xff] %v468_v32  ;;  %v476_v36 = vld [vmem:[%s3554_s22 + $0x420] sm:$0xff]  ;;  %v478_v37 = vld [vmem:[%s3554_s22 + $0x428] sm:$0xff] }
  0x2c   : > { %471 = vst [vmem:[%s3562_s23 + $0x108] sm:$0xff] %v470_v33  ;;  %473 = vst [vmem:[%s3562_s23 + $0x110] sm:$0xff] %v472_v34  ;;  %v480_v38 = vld [vmem:[%s3554_s22 + $0x430] sm:$0xff]  ;;  %v482_v39 = vld [vmem:[%s3554_s22 + $0x438] sm:$0xff] }
  0x2d   : > { %475 = vst [vmem:[%s3562_s23 + $0x118] sm:$0xff] %v474_v35  ;;  %477 = vst [vmem:[%s3562_s23 + $0x120] sm:$0xff] %v476_v36  ;;  %v484_v40 = vld [vmem:[%s3554_s22 + $0x440] sm:$0xff]  ;;  %v486_v41 = vld [vmem:[%s3554_s22 + $0x448] sm:$0xff] }
  0x2e   : > { %479 = vst [vmem:[%s3562_s23 + $0x128] sm:$0xff] %v478_v37  ;;  %481 = vst [vmem:[%s3562_s23 + $0x130] sm:$0xff] %v480_v38  ;;  %v488_v42 = vld [vmem:[%s3554_s22 + $0x450] sm:$0xff]  ;;  %v490_v43 = vld [vmem:[%s3554_s22 + $0x458] sm:$0xff] }
  0x2f   : > { %483 = vst [vmem:[%s3562_s23 + $0x138] sm:$0xff] %v482_v39  ;;  %485 = vst [vmem:[%s3562_s23 + $0x140] sm:$0xff] %v484_v40  ;;  %v492_v44 = vld [vmem:[%s3554_s22 + $0x460] sm:$0xff]  ;;  %v494_v45 = vld [vmem:[%s3554_s22 + $0x468] sm:$0xff] }
  0x30   : > { %487 = vst [vmem:[%s3562_s23 + $0x148] sm:$0xff] %v486_v41  ;;  %489 = vst [vmem:[%s3562_s23 + $0x150] sm:$0xff] %v488_v42  ;;  %v496_v46 = vld [vmem:[%s3554_s22 + $0x470] sm:$0xff]  ;;  %v498_v47 = vld [vmem:[%s3554_s22 + $0x478] sm:$0xff] }
  0x31   : > { %491 = vst [vmem:[%s3562_s23 + $0x158] sm:$0xff] %v490_v43  ;;  %493 = vst [vmem:[%s3562_s23 + $0x160] sm:$0xff] %v492_v44 }
  0x32   : > { %495 = vst [vmem:[%s3562_s23 + $0x168] sm:$0xff] %v494_v45  ;;  %497 = vst [vmem:[%s3562_s23 + $0x170] sm:$0xff] %v496_v46 }
  0x33   : > { %499 = vst [vmem:[%s3562_s23 + $0x178] sm:$0xff] %v498_v47 }
  0x34 PF: > { %p2629_p10 = scmp.ge.s32.totalorder %s3443_s30, 1  ;;  %p504_p11 = scmp.lt.s32.totalorder %s3443_s30, 5 }
  0x36   : > { %p505_p12 = pnand %p2629_p10, %p504_p11 }
  0x38   : > { %508 = sbr.rel (%p505_p12) target bundleno = 1044 (0x414), region = 82 }
  0x3f   : > { %v3209_v48 = vld [vmem:[%s4791_s2 + $0x4] ss:$8 sps:$4 sm:$0xff]   ;;  %s3660_s26 = sand.u32 1, %s3435_s28   ;;  %v3211_v49 = vld [vmem:[%s4791_s2] ss:$8 sps:$4 sm:$0xff]   ;;  %v4798_v50 = vmov 0  }
  0x40   : > { %788 = vmatprep.mubr.bf16.mxu0 %v4798_v50  ;;  %756 = vmatprep.subr.bf16.mxu0 %v3209_v48  ;;  %v3212_v51 = vld [vmem:[%s4791_s2 + $0x14] ss:$8 sps:$4 sm:$0xff]   ;;  %v3214_v52 = vld [vmem:[%s4791_s2 + $0x10] ss:$8 sps:$4 sm:$0xff]   ;;  %v3215_v53 = vld [vmem:[%s4791_s2 + $0x24] ss:$8 sps:$4 sm:$0xff]  }
  0x41   : > { %757 = vmatpush1.bf16.msra.mxu0 %v3211_v49  ;;  %v3217_v54 = vld [vmem:[%s4791_s2 + $0x20] ss:$8 sps:$4 sm:$0xff]   ;;  %v3218_v55 = vld [vmem:[%s4791_s2 + $0x34] ss:$8 sps:$4 sm:$0xff]   ;;  %v3220_v56 = vld [vmem:[%s4791_s2 + $0x30] ss:$8 sps:$4 sm:$0xff]  }
  0x42   : > { %758 = vmatprep.subr.bf16.mxu0 %v3212_v51  ;;  %v3221_v57 = vld [vmem:[%s4791_s2 + $0x44] ss:$8 sps:$4 sm:$0xff]   ;;  %v3223_v58 = vld [vmem:[%s4791_s2 + $0x40] ss:$8 sps:$4 sm:$0xff]   ;;  %v3224_v59 = vld [vmem:[%s4791_s2 + $0x54] ss:$8 sps:$4 sm:$0xff]  }
  0x43   : > { %s3147_s22 = smul.u32 384, %s3660_s26  ;;  %v3226_v60 = vld [vmem:[%s4791_s2 + $0x50] ss:$8 sps:$4 sm:$0xff]   ;;  %v3227_v61 = vld [vmem:[%s4791_s2 + $0x64] ss:$8 sps:$4 sm:$0xff]   ;;  %s2631_s20 = sshll.u32 %s3522_s9, 4 }
  0x44   : > { %v3229_v62 = vld [vmem:[%s4791_s2 + $0x60] ss:$8 sps:$4 sm:$0xff]   ;;  %v3230_v63 = vld [vmem:[%s4791_s2 + $0x74] ss:$8 sps:$4 sm:$0xff]   ;;  %v3232_v0 = vld [vmem:[%s4791_s2 + $0x70] ss:$8 sps:$4 sm:$0xff]  }
  0x45   : > { %759 = vmatpush1.bf16.msra.mxu0 %v3214_v52  ;;  %s3709_s21 = scalar_lea.vmem [#allocation2], %s3147_s22  ;;  %p555_p13 = scmp.lt.s32.totalorder %s2631_s20, 63 }
  0x46   : > { %760 = vmatprep.subr.bf16.mxu0 %v3215_v53  ;;  %v580_v1 = vld [vmem:[%s3709_s21] sm:$0xff]  ;;  %v581_v2 = vld [vmem:[%s3709_s21 + $0x8] sm:$0xff]  ;;  %v582_v4 = vld [vmem:[%s3709_s21 + $0x10] sm:$0xff]  ;;  %s4855_s0 = sld [smem:[#allocation43_spill]]  ;;  %s3148_s13 = smul.u32 192, %s3660_s26 }
  0x47   : > { %v636_v3 = vpack.c.bf16 %v581_v2, %v580_v1  ;;  %v583_v5 = vld [vmem:[%s3709_s21 + $0x18] sm:$0xff]  ;;  %v584_v7 = vld [vmem:[%s3709_s21 + $0x20] sm:$0xff]  ;;  %v585_v8 = vld [vmem:[%s3709_s21 + $0x28] sm:$0xff]  ;;  %s4904_s20 = smov (!%p555_p13, %s2631_s20), 63  ;;  %s2630_s18 = sshll.u32 %s3660_s26, 6 }
  0x48   : > { %v637_v6 = vpack.c.bf16 %v583_v5, %v582_v4  ;;  %v638_v9 = vpack.c.bf16 %v585_v8, %v584_v7  ;;  %v586_v10 = vld [vmem:[%s3709_s21 + $0x30] sm:$0xff]  ;;  %v587_v11 = vld [vmem:[%s3709_s21 + $0x38] sm:$0xff]  ;;  %v588_v13 = vld [vmem:[%s3709_s21 + $0x40] sm:$0xff]  ;;  %s4535_s17 = scalar_lea.vmem [#allocation5], %s3148_s13  ;;  %s4828_s19 = sshll.u32 %s3522_s9, 10 }
  0x49   : > { %761 = vmatpush1.bf16.msra.mxu0 %v3217_v54  ;;  %v639_v12 = vpack.c.bf16 %v587_v11, %v586_v10  ;;  %v589_v14 = vld [vmem:[%s3709_s21 + $0x48] sm:$0xff]  ;;  %v590_v16 = vld [vmem:[%s3709_s21 + $0x50] sm:$0xff]  ;;  %v591_v17 = vld [vmem:[%s3709_s21 + $0x58] sm:$0xff]  ;;  %s4721_s23 = scalar_lea.hbm %s4796_s7, %s4828_s19  ;;  %s2449_s25 = scalar_lea.sflag [#allocation4], %s3660_s26 }
  0x4a   : > { %762 = vmatprep.subr.bf16.mxu0 %v3218_v55  ;;  %v640_v15 = vpack.c.bf16 %v589_v14, %v588_v13  ;;  %v641_v18 = vpack.c.bf16 %v591_v17, %v590_v16  ;;  %v592_v19 = vld [vmem:[%s3709_s21 + $0x60] sm:$0xff]  ;;  %v593_v20 = vld [vmem:[%s3709_s21 + $0x68] sm:$0xff]  ;;  %v594_v22 = vld [vmem:[%s3709_s21 + $0x70] sm:$0xff]  ;;  %s3446_s12 = smov [#allocation3]  }
  0x4b   : > { %v642_v21 = vpack.c.bf16 %v593_v20, %v592_v19  ;;  %v595_v23 = vld [vmem:[%s3709_s21 + $0x78] sm:$0xff]  ;;  %v596_v25 = vld [vmem:[%s3709_s21 + $0x80] sm:$0xff]  ;;  %v597_v26 = vld [vmem:[%s3709_s21 + $0x88] sm:$0xff]  ;;  %s3381_s13 = sshll.u32 %s3446_s12, 4  ;;  %s3382_s13 = int_to_ptr.vmem [resolvable:$false] %s3381_s13 }
  0x4c   : > { %v643_v24 = vpack.c.bf16 %v595_v23, %v594_v22  ;;  %v644_v27 = vpack.c.bf16 %v597_v26, %v596_v25  ;;  %v598_v28 = vld [vmem:[%s3709_s21 + $0x90] sm:$0xff]  ;;  %v599_v29 = vld [vmem:[%s3709_s21 + $0x98] sm:$0xff]  ;;  %v600_v31 = vld [vmem:[%s3709_s21 + $0xa0] sm:$0xff] }
  0x4d   : > { %763 = vmatpush1.bf16.msra.mxu0 %v3220_v56  ;;  %v645_v30 = vpack.c.bf16 %v599_v29, %v598_v28  ;;  %v601_v32 = vld [vmem:[%s3709_s21 + $0xa8] sm:$0xff]  ;;  %v602_v34 = vld [vmem:[%s3709_s21 + $0xb0] sm:$0xff]  ;;  %v603_v35 = vld [vmem:[%s3709_s21 + $0xb8] sm:$0xff] }
  0x4e   : > { %764 = vmatprep.subr.bf16.mxu0 %v3221_v57  ;;  %v646_v33 = vpack.c.bf16 %v601_v32, %v600_v31  ;;  %v647_v36 = vpack.c.bf16 %v603_v35, %v602_v34  ;;  %v604_v37 = vld [vmem:[%s3709_s21 + $0xc0] sm:$0xff]  ;;  %v605_v38 = vld [vmem:[%s3709_s21 + $0xc8] sm:$0xff]  ;;  %v606_v40 = vld [vmem:[%s3709_s21 + $0xd0] sm:$0xff] }
  0x4f   : > { %v648_v39 = vpack.c.bf16 %v605_v38, %v604_v37  ;;  %v607_v41 = vld [vmem:[%s3709_s21 + $0xd8] sm:$0xff]  ;;  %v608_v43 = vld [vmem:[%s3709_s21 + $0xe0] sm:$0xff]  ;;  %v609_v44 = vld [vmem:[%s3709_s21 + $0xe8] sm:$0xff] }
  0x50   : > { %v649_v42 = vpack.c.bf16 %v607_v41, %v606_v40  ;;  %v650_v45 = vpack.c.bf16 %v609_v44, %v608_v43  ;;  %v610_v46 = vld [vmem:[%s3709_s21 + $0xf0] sm:$0xff]  ;;  %v611_v47 = vld [vmem:[%s3709_s21 + $0xf8] sm:$0xff]  ;;  %v612_v49 = vld [vmem:[%s3709_s21 + $0x100] sm:$0xff] }
  0x51   : > { %765 = vmatpush1.bf16.msra.mxu0 %v3223_v58  ;;  %v651_v48 = vpack.c.bf16 %v611_v47, %v610_v46  ;;  %v613_v51 = vld [vmem:[%s3709_s21 + $0x108] sm:$0xff]  ;;  %v614_v53 = vld [vmem:[%s3709_s21 + $0x110] sm:$0xff]  ;;  %v615_v54 = vld [vmem:[%s3709_s21 + $0x118] sm:$0xff] }
  0x52   : > { %766 = vmatprep.subr.bf16.mxu0 %v3224_v59  ;;  %v652_v52 = vpack.c.bf16 %v613_v51, %v612_v49  ;;  %v653_v55 = vpack.c.bf16 %v615_v54, %v614_v53  ;;  %v616_v56 = vld [vmem:[%s3709_s21 + $0x120] sm:$0xff]  ;;  %v617_v57 = vld [vmem:[%s3709_s21 + $0x128] sm:$0xff]  ;;  %v618_v59 = vld [vmem:[%s3709_s21 + $0x130] sm:$0xff] }
  0x53   : > { %v654_v58 = vpack.c.bf16 %v617_v57, %v616_v56  ;;  %v622_v1 = vld [vmem:[%s3709_s21 + $0x150] sm:$0xff]  ;;  %v623_v2 = vld [vmem:[%s3709_s21 + $0x158] sm:$0xff]  ;;  %v624_v4 = vld [vmem:[%s3709_s21 + $0x160] sm:$0xff] }
  0x54   : > { %v625_v5 = vld [vmem:[%s3709_s21 + $0x168] sm:$0xff]  ;;  %v626_v7 = vld [vmem:[%s3709_s21 + $0x170] sm:$0xff]  ;;  %v627_v8 = vld [vmem:[%s3709_s21 + $0x178] sm:$0xff] }
  0x55   : > { %767 = vmatpush1.bf16.msra.mxu0 %v3226_v60  ;;  %v619_v60 = vld [vmem:[%s3709_s21 + $0x138] sm:$0xff]  ;;  %v3233_v10 = vld [vmem:[%s4792_s3 + $0x40] sm:$0xff]   ;;  %v3236_v13 = vld [vmem:[%s4792_s3 + $0x8] sm:$0xff]  }
  0x56   : > { %768 = vmatprep.subr.bf16.mxu0 %v3227_v61  ;;  %v655_v61 = vpack.c.bf16 %v619_v60, %v618_v59  ;;  %v3234_v11 = vld [vmem:[%s4792_s3] sm:$0xff]   ;;  %3034 = vmatprep.subr.bf16.mxu1 %v3233_v10  ;;  %v3238_v17 = vld [vmem:[%s4792_s3 + $0x10] sm:$0xff]   ;;  %v3239_v22 = vld [vmem:[%s4792_s3 + $0x58] sm:$0xff]  }
  0x57   : > { %3035 = vmatpush3.bf16.msra.mxu1 %v3234_v11  ;;  %v3240_v23 = vld [vmem:[%s4792_s3 + $0x18] sm:$0xff]   ;;  %v3241_v25 = vld [vmem:[%s4792_s3 + $0x60] sm:$0xff]   ;;  %v3243_v32 = vld [vmem:[%s4792_s3 + $0x68] sm:$0xff]  }
  0x58   : > { %v3245_v35 = vld [vmem:[%s4792_s3 + $0x70] sm:$0xff]   ;;  %v3248_v43 = vld [vmem:[%s4792_s3 + $0x38] sm:$0xff]  }
  0x59   : > { %769 = vmatpush1.bf16.msra.mxu0 %v3229_v62  ;;  %v620_v62 = vld [vmem:[%s3709_s21 + $0x140] sm:$0xff]  ;;  %v3246_v37 = vld [vmem:[%s4792_s3 + $0x30] sm:$0xff]  }
  0x5a   : > { %770 = vmatprep.subr.bf16.mxu0 %v3230_v63  ;;  %v621_v63 = vld [vmem:[%s3709_s21 + $0x148] sm:$0xff]  ;;  %s2632_s21 = sshll.u32 %s4904_s20, 3 }
  0x5b   : > { %s4158_s24 = scalar_lea.vmem %s4855_s0, %s2632_s21 }
  0x5d   : > { %771 = vmatpush1.bf16.msra.mxu0 %v3232_v0  ;;  %v656_v0 = vpack.c.bf16 %v621_v63, %v620_v62 }
  0x60   : > { %789 = vmatmul.mubr.bf16.vlgmr.msra.gmra.mrb[0].mxu0 %v636_v3  ;;  %v657_v3 = vpack.c.bf16 %v623_v2, %v622_v1 }
  0x61   : > { %798 = vmatprep.mubr.bf16.mxu0 %v4798_v50 }
  0x68   : > { %799 = vmatmul.mubr.bf16.gmra.mrb[4].mxu0 %v637_v6  ;;  %v658_v6 = vpack.c.bf16 %v625_v5, %v624_v4 }
  0x69   : > { %808 = vmatprep.mubr.bf16.mxu0 %v4798_v50 }
  0x70   : > { %809 = vmatmul.mubr.bf16.gmra.mrb[8].mxu0 %v638_v9  ;;  %v659_v9 = vpack.c.bf16 %v627_v8, %v626_v7 }
  0x71   : > { %818 = vmatprep.mubr.bf16.mxu0 %v4798_v50 }
  0x78   : > { %819 = vmatmul.mubr.bf16.gmra.mrb[12].mxu0 %v639_v12  ;;  %v3235_v12 = vld [vmem:[%s4792_s3 + $0x48] sm:$0xff]  }
  0x79   : > { %828 = vmatprep.mubr.bf16.mxu0 %v4798_v50  ;;  %3036 = vmatprep.subr.bf16.mxu1 %v3235_v12 }
  0x7a   : > { %3037 = vmatpush3.bf16.msra.mxu1 %v3236_v13 }
  0x80   : > { %829 = vmatmul.mubr.bf16.gmra.mrb[16].mxu0 %v640_v15  ;;  %v3237_v15 = vld [vmem:[%s4792_s3 + $0x50] sm:$0xff]  }
  0x81   : > { %838 = vmatprep.mubr.bf16.mxu0 %v4798_v50  ;;  %3038 = vmatprep.subr.bf16.mxu1 %v3237_v15 }
  0x82   : > { %3039 = vmatpush3.bf16.msra.mxu1 %v3238_v17 }
  0x83   : > { %3040 = vmatprep.subr.bf16.mxu1 %v3239_v22 }
  0x86   : > { %3041 = vmatpush3.bf16.msra.mxu1 %v3240_v23 }
  0x87   : > { %3042 = vmatprep.subr.bf16.mxu1 %v3241_v25 }
  0x88   : > { %839 = vmatmul.mubr.bf16.gmra.mrb[20].mxu0 %v641_v18 }
  0x89   : > { %848 = vmatprep.mubr.bf16.mxu0 %v4798_v50 }
  0x90   : > { %849 = vmatmul.mubr.bf16.gmra.mrb[24].mxu0 %v642_v21 }
  0x91   : > { %858 = vmatprep.mubr.bf16.mxu0 %v4798_v50 }
  0x98   : > { %859 = vmatmul.mubr.bf16.gmra.mrb[28].mxu0 %v643_v24 }
  0x99   : > { %868 = vmatprep.mubr.bf16.mxu0 %v4798_v50 }
  0xa0   : > { %869 = vmatmul.mubr.bf16.gmra.mrb[32].mxu0 %v644_v27  ;;  %v3242_v27 = vld [vmem:[%s4792_s3 + $0x20] sm:$0xff]  }
  0xa1   : > { %878 = vmatprep.mubr.bf16.mxu0 %v4798_v50  ;;  %3043 = vmatpush3.bf16.msra.mxu1 %v3242_v27 }
  0xa2   : > { %3044 = vmatprep.subr.bf16.mxu1 %v3243_v32 }
  0xa8   : > { %879 = vmatmul.mubr.bf16.gmra.mrb[36].mxu0 %v645_v30 }
  0xa9   : > { %888 = vmatprep.mubr.bf16.mxu0 %v4798_v50 }
  0xb0   : > { %889 = vmatmul.mubr.bf16.gmra.mrb[40].mxu0 %v646_v33  ;;  %v3244_v33 = vld [vmem:[%s4792_s3 + $0x28] sm:$0xff]  }
  0xb1   : > { %898 = vmatprep.mubr.bf16.mxu0 %v4798_v50  ;;  %3045 = vmatpush3.bf16.msra.mxu1 %v3244_v33 }
  0xb2   : > { %3046 = vmatprep.subr.bf16.mxu1 %v3245_v35 }
  0xb5   : > { %3047 = vmatpush3.bf16.msra.mxu1 %v3246_v37 }
  0xb8   : > { %899 = vmatmul.mubr.bf16.gmra.mrb[44].mxu0 %v647_v36 }
  0xb9   : > { %908 = vmatprep.mubr.bf16.mxu0 %v4798_v50 }
  0xc0   : > { %909 = vmatmul.mubr.bf16.gmra.mrb[48].mxu0 %v648_v39 }
  0xc1   : > { %918 = vmatprep.mubr.bf16.mxu0 %v4798_v50 }
  0xc8   : > { %919 = vmatmul.mubr.bf16.gmra.mrb[52].mxu0 %v649_v42  ;;  %v3247_v42 = vld [vmem:[%s4792_s3 + $0x78] sm:$0xff]  }
  0xc9   : > { %928 = vmatprep.mubr.bf16.mxu0 %v4798_v50  ;;  %3048 = vmatprep.subr.bf16.mxu1 %v3247_v42 }
  0xca   : > { %3049 = vmatpush3.bf16.msra.mxu1 %v3248_v43 }
  0xd0   : > { %929 = vmatmul.mubr.bf16.gmra.mrb[56].mxu0 %v650_v45 }
  0xd1   : > { %938 = vmatprep.mubr.bf16.mxu0 %v4798_v50 }
  0xd8   : > { %939 = vmatmul.mubr.bf16.gmra.mrb[60].mxu0 %v651_v48 }
  0xd9   : > { %948 = vmatprep.mubr.bf16.mxu0 %v4798_v50 }
  0xe0   : > { %949 = vmatmul.mubr.bf16.gmra.mrb[64].mxu0 %v652_v52 }
  0xe1   : > { %958 = vmatprep.mubr.bf16.mxu0 %v4798_v50 }
  0xe8   : > { %959 = vmatmul.mubr.bf16.gmra.mrb[68].mxu0 %v653_v55 }
  0xe9   : > { %968 = vmatprep.mubr.bf16.mxu0 %v4798_v50 }
  0xf0   : > { %969 = vmatmul.mubr.bf16.gmra.mrb[72].mxu0 %v654_v58 }
  0xf1   : > { %978 = vmatprep.mubr.bf16.mxu0 %v4798_v50 }
  0xf8   : > { %979 = vmatmul.mubr.bf16.gmra.mrb[76].mxu0 %v655_v61 }
  0xf9   : > { %988 = vmatprep.mubr.bf16.mxu0 %v4798_v50 }
 0x100   : > { %989 = vmatmul.mubr.bf16.gmra.mrb[80].mxu0 %v656_v0 }
 0x101   : > { %998 = vmatprep.mubr.bf16.mxu0 %v4798_v50 }
 0x108   : > { %999 = vmatmul.mubr.bf16.gmra.mrb[84].mxu0 %v657_v3 }
 0x109   : > { %1008 = vmatprep.mubr.bf16.mxu0 %v4798_v50 }
 0x110   : > { %1009 = vmatmul.mubr.bf16.gmra.mrb[88].mxu0 %v658_v6 }
 0x111   : > { %1018 = vmatprep.mubr.bf16.mxu0 %v4798_v50 }
 0x118   : > { %1019 = vmatmul.mubr.bf16.gmra.mrb[92].mxu0 %v659_v9 }
 0x133   : > { %v3794_v14 = vpop.f32.mrb[0].mxu0 }
 0x134   : > { %v3799_v16 = vpop.f32.mrb[1].mxu0 }
 0x135   : > { %v3806_v18 = vmul.f32 %v3799_v16, %v3794_v14  ;;  %v3808_v19 = vpop.f32.mrb[2].mxu0  ;;  %v1109_v13 = vmul.f32 %v3799_v16, %v3799_v16 }
 0x136   : > { %v3810_v20 = vpop.f32.mrb[3].mxu0 }
 0x137   : > { %v3814_v21 = vmul.f32 %v3810_v20, %v3808_v19  ;;  %v1110_v23 = vmul.f32 %v3810_v20, %v3810_v20 }
 0x13b   : > { %v3822_v24 = vpop.f32.mrb[4].mxu0 }
 0x13c   : > { %v3827_v26 = vpop.f32.mrb[5].mxu0 }
 0x13d   : > { %v3834_v28 = vmul.f32 %v3827_v26, %v3822_v24  ;;  %v3836_v29 = vpop.f32.mrb[6].mxu0  ;;  %v1111_v20 = vmul.f32 %v3827_v26, %v3827_v26 }
 0x13e   : > { %v3838_v30 = vpop.f32.mrb[7].mxu0 }
 0x13f   : > { %v3842_v31 = vmul.f32 %v3838_v30, %v3836_v29 }
 0x143   : > { %v3850_v34 = vpop.f32.mrb[8].mxu0 }
 0x144   : > { %v3855_v36 = vpop.f32.mrb[9].mxu0 }
 0x145   : > { %v3862_v38 = vmul.f32 %v3855_v36, %v3850_v34  ;;  %v3864_v39 = vpop.f32.mrb[10].mxu0 }
 0x146   : > { %4832 = vst [vmem:[#allocation11_spill] sm:$0xff] %v3864_v39  ;;  %v3866_v40 = vpop.f32.mrb[11].mxu0 }
 0x147   : > { %v3870_v41 = vmul.f32 %v3866_v40, %v3864_v39 }
 0x14b   : > { %v3878_v44 = vpop.f32.mrb[12].mxu0 }
 0x14c   : > { %4833 = vst [vmem:[#allocation12_spill] sm:$0xff] %v3878_v44  ;;  %v3880_v45 = vpop.f32.mrb[13].mxu0 }
 0x14d   : > { %v3884_v46 = vmul.f32 %v3880_v45, %v3878_v44  ;;  %v3886_v47 = vpop.f32.mrb[14].mxu0 }
 0x14e   : > { %4834 = vst [vmem:[#allocation13_spill] sm:$0xff] %v3886_v47  ;;  %v3888_v48 = vpop.f32.mrb[15].mxu0 }
 0x14f   : > { %v3892_v49 = vmul.f32 %v3888_v48, %v3886_v47 }
 0x153   : > { %v3894_v51 = vpop.f32.mrb[16].mxu0 }
 0x154   : > { %4835 = vst [vmem:[#allocation14_spill] sm:$0xff] %v3894_v51  ;;  %v3896_v52 = vpop.f32.mrb[17].mxu0 }
 0x155   : > { %v3900_v53 = vmul.f32 %v3896_v52, %v3894_v51  ;;  %v3902_v54 = vpop.f32.mrb[18].mxu0 }
 0x156   : > { %4836 = vst [vmem:[#allocation15_spill] sm:$0xff] %v3902_v54  ;;  %v3904_v55 = vpop.f32.mrb[19].mxu0 }
 0x157   : > { %v3908_v56 = vmul.f32 %v3904_v55, %v3902_v54 }
 0x15b   : > { %v3910_v57 = vpop.f32.mrb[20].mxu0 }
 0x15c   : > { %4837 = vst [vmem:[#allocation16_spill] sm:$0xff] %v3910_v57  ;;  %v3912_v58 = vpop.f32.mrb[21].mxu0 }
 0x15d   : > { %v3916_v59 = vmul.f32 %v3912_v58, %v3910_v57  ;;  %v3918_v60 = vpop.f32.mrb[22].mxu0 }
 0x15e   : > { %4838 = vst [vmem:[#allocation17_spill] sm:$0xff] %v3918_v60  ;;  %v3920_v61 = vpop.f32.mrb[23].mxu0 }
 0x15f   : > { %v3924_v62 = vmul.f32 %v3920_v61, %v3918_v60 }
 0x163   : > { %v3926_v63 = vpop.f32.mrb[24].mxu0 }
 0x164   : > { %4839 = vst [vmem:[#allocation18_spill] sm:$0xff] %v3926_v63  ;;  %v3928_v0 = vpop.f32.mrb[25].mxu0 }
 0x165   : > { %v3932_v1 = vmul.f32 %v3928_v0, %v3926_v63  ;;  %v3934_v2 = vpop.f32.mrb[26].mxu0 }
 0x166   : > { %4840 = vst [vmem:[#allocation19_spill] sm:$0xff] %v3934_v2  ;;  %v3936_v3 = vpop.f32.mrb[27].mxu0 }
 0x167   : > { %v3940_v4 = vmul.f32 %v3936_v3, %v3934_v2 }
 0x16b   : > { %v3942_v5 = vpop.f32.mrb[28].mxu0 }
 0x16c   : > { %4841 = vst [vmem:[#allocation20_spill] sm:$0xff] %v3942_v5  ;;  %v3944_v6 = vpop.f32.mrb[29].mxu0 }
 0x16d   : > { %v3948_v7 = vmul.f32 %v3944_v6, %v3942_v5  ;;  %v3950_v8 = vpop.f32.mrb[30].mxu0 }
 0x16e   : > { %4842 = vst [vmem:[#allocation21_spill] sm:$0xff] %v3950_v8  ;;  %v3952_v9 = vpop.f32.mrb[31].mxu0 }
 0x16f   : > { %v3956_v10 = vmul.f32 %v3952_v9, %v3950_v8 }
 0x173   : > { %v3958_v11 = vpop.f32.mrb[32].mxu0 }
 0x174   : > { %v872_v12 = vpop.f32.mrb[33].mxu0 }
 0x175   : > { %v1045_v15 = vmul.f32 %v872_v12, %v3958_v11  ;;  %v1125_v17 = vmul.f32 %v872_v12, %v872_v12  ;;  %v3963_v22 = vpop.f32.mrb[34].mxu0 }
 0x176   : > { %v876_v25 = vpop.f32.mrb[35].mxu0 }
 0x177   : > { %v3968_v27 = vadd.f32 %v1045_v15, %v3806_v18  ;;  %v3970_v32 = vadd.f32 %v1125_v17, %v1109_v13  ;;  %v1046_v33 = vmul.f32 %v876_v25, %v3963_v22  ;;  %v1126_v35 = vmul.f32 %v876_v25, %v876_v25 }
 0x178   : > { %v1112_v13 = vmul.f32 %v3838_v30, %v3838_v30  ;;  %v1113_v30 = vmul.f32 %v3855_v36, %v3855_v36 }
 0x179   : > { %v3974_v37 = vadd.f32 %v1046_v33, %v3814_v21  ;;  %v3976_v16 = vadd.f32 %v1126_v35, %v1110_v23 }
 0x17b   : > { %v3978_v42 = vpop.f32.mrb[36].mxu0 }
 0x17c   : > { %v882_v43 = vpop.f32.mrb[37].mxu0 }
 0x17d   : > { %v1047_v12 = vmul.f32 %v882_v43, %v3978_v42  ;;  %v1127_v18 = vmul.f32 %v882_v43, %v882_v43  ;;  %v3983_v15 = vpop.f32.mrb[38].mxu0 }
 0x17e   : > { %v886_v17 = vpop.f32.mrb[39].mxu0 }
 0x17f   : > { %v3988_v21 = vadd.f32 %v1047_v12, %v3834_v28  ;;  %v3990_v23 = vadd.f32 %v1127_v18, %v1111_v20  ;;  %v1048_v25 = vmul.f32 %v886_v17, %v3983_v15  ;;  %v1128_v33 = vmul.f32 %v886_v17, %v886_v17  ;;  %v3251_v20 = vld [vmem:[%s4794_s5 + $0x4] ss:$12 sps:$4 sm:$0xff]  }
 0x180   : > { %1838 = vmatprep.subr.bf16.mxu1 %v3251_v20 }
 0x181   : > { %v3994_v35 = vadd.f32 %v1048_v25, %v3842_v31  ;;  %v3996_v26 = vadd.f32 %v1128_v33, %v1112_v13  ;;  %v1114_v31 = vmul.f32 %v3866_v40, %v3866_v40  ;;  %v1115_v40 = vmul.f32 %v3880_v45, %v3880_v45 }
 0x183   : > { %v3998_v43 = vpop.f32.mrb[40].mxu0 }
 0x184   : > { %4843 = vst [vmem:[#allocation22_spill] sm:$0xff] %v3998_v43  ;;  %v892_v50 = vpop.f32.mrb[41].mxu0 }
 0x185   : > { %v1049_v8 = vmul.f32 %v892_v50, %v3998_v43  ;;  %v1129_v28 = vmul.f32 %v892_v50, %v892_v50  ;;  %v4003_v12 = vpop.f32.mrb[42].mxu0 }
 0x186   : > { %4844 = vst [vmem:[#allocation23_spill] sm:$0xff] %v4003_v12  ;;  %v896_v18 = vpop.f32.mrb[43].mxu0 }
 0x187   : > { %v4011_v13 = vadd.f32 %v1049_v8, %v3862_v38  ;;  %v4013_v17 = vadd.f32 %v1129_v28, %v1113_v30  ;;  %v1050_v36 = vmul.f32 %v896_v18, %v4003_v12  ;;  %v1130_v25 = vmul.f32 %v896_v18, %v896_v18 }
 0x188   : > { %v1116_v28 = vmul.f32 %v3888_v48, %v3888_v48  ;;  %v1117_v48 = vmul.f32 %v3896_v52, %v3896_v52 }
 0x189   : > { %v4017_v50 = vadd.f32 %v1050_v36, %v3870_v41  ;;  %v4019_v33 = vadd.f32 %v1130_v25, %v1114_v31 }
 0x18b   : > { %v4021_v5 = vpop.f32.mrb[44].mxu0 }
 0x18c   : > { %4845 = vst [vmem:[#allocation24_spill] sm:$0xff] %v4021_v5  ;;  %v902_v2 = vpop.f32.mrb[45].mxu0 }
 0x18d   : > { %v1051_v38 = vmul.f32 %v902_v2, %v4021_v5  ;;  %v1131_v8 = vmul.f32 %v902_v2, %v902_v2  ;;  %v4026_v30 = vpop.f32.mrb[46].mxu0 }
 0x18e   : > { %4846 = vst [vmem:[#allocation25_spill] sm:$0xff] %v4026_v30  ;;  %v906_v20 = vpop.f32.mrb[47].mxu0 }
 0x18f   : > { %v4031_v41 = vadd.f32 %v1051_v38, %v3884_v46  ;;  %v4033_v31 = vadd.f32 %v1131_v8, %v1115_v40  ;;  %v1052_v18 = vmul.f32 %v906_v20, %v4026_v30  ;;  %v1132_v36 = vmul.f32 %v906_v20, %v906_v20 }
 0x190   : > { %v1118_v40 = vmul.f32 %v3904_v55, %v3904_v55  ;;  %v1119_v55 = vmul.f32 %v3912_v58, %v3912_v58 }
 0x191   : > { %v4037_v25 = vadd.f32 %v1052_v18, %v3892_v49  ;;  %v4039_v45 = vadd.f32 %v1132_v36, %v1116_v28 }
 0x193   : > { %v4041_v2 = vpop.f32.mrb[48].mxu0 }
 0x194   : > { %4847 = vst [vmem:[#allocation26_spill] sm:$0xff] %v4041_v2  ;;  %v912_v63 = vpop.f32.mrb[49].mxu0 }
 0x195   : > { %v1053_v60 = vmul.f32 %v912_v63, %v4041_v2  ;;  %v1133_v46 = vmul.f32 %v912_v63, %v912_v63  ;;  %v4046_v38 = vpop.f32.mrb[50].mxu0 }
 0x196   : > { %4848 = vst [vmem:[#allocation27_spill] sm:$0xff] %v4046_v38  ;;  %v916_v8 = vpop.f32.mrb[51].mxu0 }
 0x197   : > { %v4051_v49 = vadd.f32 %v1053_v60, %v3900_v53  ;;  %v4053_v28 = vadd.f32 %v1133_v46, %v1117_v48  ;;  %v1054_v20 = vmul.f32 %v916_v8, %v4046_v38  ;;  %v1134_v18 = vmul.f32 %v916_v8, %v916_v8 }
 0x198   : > { %v1120_v48 = vmul.f32 %v3920_v61, %v3920_v61  ;;  %v1121_v61 = vmul.f32 %v3928_v0, %v3928_v0 }
 0x199   : > { %v4057_v36 = vadd.f32 %v1054_v20, %v3908_v56  ;;  %v4059_v52 = vadd.f32 %v1134_v18, %v1118_v40 }
 0x19b   : > { %v4061_v63 = vpop.f32.mrb[52].mxu0 }
 0x19c   : > { %4849 = vst [vmem:[#allocation28_spill] sm:$0xff] %v4061_v63  ;;  %v922_v57 = vpop.f32.mrb[53].mxu0 }
 0x19d   : > { %v1055_v54 = vmul.f32 %v922_v57, %v4061_v63  ;;  %v1135_v53 = vmul.f32 %v922_v57, %v922_v57  ;;  %v4066_v60 = vpop.f32.mrb[54].mxu0 }
 0x19e   : > { %4850 = vst [vmem:[#allocation29_spill] sm:$0xff] %v4066_v60  ;;  %v926_v46 = vpop.f32.mrb[55].mxu0 }
 0x19f   : > { %v4071_v56 = vadd.f32 %v1055_v54, %v3916_v59  ;;  %v4073_v40 = vadd.f32 %v1135_v53, %v1119_v55  ;;  %v1056_v8 = vmul.f32 %v926_v46, %v4066_v60  ;;  %v1136_v20 = vmul.f32 %v926_v46, %v926_v46 }
 0x1a0   : > { %v1122_v55 = vmul.f32 %v3936_v3, %v3936_v3  ;;  %v1123_v3 = vmul.f32 %v3944_v6, %v3944_v6 }
 0x1a1   : > { %v4077_v18 = vadd.f32 %v1056_v8, %v3924_v62  ;;  %v4079_v58 = vadd.f32 %v1136_v20, %v1120_v48 }
 0x1a3   : > { %v4081_v57 = vpop.f32.mrb[56].mxu0 }
 0x1a4   : > { %4851 = vst [vmem:[#allocation30_spill] sm:$0xff] %v4081_v57  ;;  %v932_v63 = vpop.f32.mrb[57].mxu0 }
 0x1a5   : > { %v1057_v38 = vmul.f32 %v932_v63, %v4081_v57  ;;  %v1137_v54 = vmul.f32 %v932_v63, %v932_v63  ;;  %v4086_v59 = vpop.f32.mrb[58].mxu0 }
 0x1a6   : > { %4852 = vst [vmem:[#allocation31_spill] sm:$0xff] %v4086_v59  ;;  %v936_v53 = vpop.f32.mrb[59].mxu0 }
 0x1a7   : > { %v4091_v62 = vadd.f32 %v1057_v38, %v3932_v1  ;;  %v4093_v48 = vadd.f32 %v1137_v54, %v1121_v61  ;;  %v1058_v46 = vmul.f32 %v936_v53, %v4086_v59  ;;  %v1138_v8 = vmul.f32 %v936_v53, %v936_v53 }
 0x1a8   : > { %v1124_v54 = vmul.f32 %v3952_v9, %v3952_v9 }
 0x1a9   : > { %v4097_v20 = vadd.f32 %v1058_v46, %v3940_v4  ;;  %v4099_v0 = vadd.f32 %v1138_v8, %v1122_v55 }
 0x1ab   : > { %v4101_v63 = vpop.f32.mrb[60].mxu0 }
 0x1ac   : > { %4853 = vst [vmem:[#allocation32_spill] sm:$0xff] %v4101_v63  ;;  %v942_v57 = vpop.f32.mrb[61].mxu0 }
 0x1ad   : > { %v1059_v1 = vmul.f32 %v942_v57, %v4101_v63  ;;  %v1139_v38 = vmul.f32 %v942_v57, %v942_v57  ;;  %v4106_v61 = vpop.f32.mrb[62].mxu0 }
 0x1ae   : > { %4854 = vst [vmem:[#allocation33_spill] sm:$0xff] %v4106_v61  ;;  %v946_v53 = vpop.f32.mrb[63].mxu0 }
 0x1af   : > { %v4111_v4 = vadd.f32 %v1059_v1, %v3948_v7  ;;  %v4113_v55 = vadd.f32 %v1139_v38, %v1123_v3  ;;  %v1060_v46 = vmul.f32 %v946_v53, %v4106_v61  ;;  %v1140_v8 = vmul.f32 %v946_v53, %v946_v53  ;;  %v565_v61 = vld [vmem:[%s4158_s24 + $0x8] sm:$0xff] }
 0x1b1   : > { %v4117_v59 = vadd.f32 %v1060_v46, %v3956_v10  ;;  %v4119_v6 = vadd.f32 %v1140_v8, %v1124_v54 }
 0x1b3   : > { %v4121_v57 = vpop.f32.mrb[64].mxu0 }
 0x1b4   : > { %v952_v63 = vpop.f32.mrb[65].mxu0 }
 0x1b5   : > { %v1061_v9 = vmul.f32 %v952_v63, %v4121_v57  ;;  %v1141_v60 = vmul.f32 %v952_v63, %v952_v63  ;;  %v4125_v2 = vpop.f32.mrb[66].mxu0 }
 0x1b6   : > { %v956_v7 = vpop.f32.mrb[67].mxu0 }
 0x1b7   : > { %v4128_v3 = vadd.f32 %v3968_v27, %v1061_v9  ;;  %v1158_v1 = vadd.f32 %v3970_v32, %v1141_v60  ;;  %v1062_v10 = vmul.f32 %v956_v7, %v4125_v2  ;;  %v1142_v38 = vmul.f32 %v956_v7, %v956_v7 }
 0x1b9   : > { %v4133_v54 = vadd.f32 %v3974_v37, %v1062_v10  ;;  %v1160_v53 = vadd.f32 %v3976_v16, %v1142_v38  ;;  %3281 = vrsqrt.f32 %v1158_v1  ;;  %vm1191_vm0 = vcmp.eq.f32.partialorder %v1158_v1, inf }
 0x1ba   : > { %vm1193_vm1 = vcmp.eq.f32.partialorder %v1158_v1, 0.0 }
 0x1bb   : > { %v4136_v46 = vpop.f32.mrb[68].mxu0  ;;  %3283 = vrsqrt.f32 %v1160_v53  ;;  %vm1198_vm2 = vcmp.eq.f32.partialorder %v1160_v53, inf  ;;  %v1201_v5 = vand.u32 2147483648, %v1160_v53  ;;  %vm1200_vm3 = vcmp.eq.f32.partialorder %v1160_v53, 0.0 }
 0x1bc   : > { %v962_v63 = vpop.f32.mrb[69].mxu0 }
 0x1bd   : > { %v1063_v27 = vmul.f32 %v962_v63, %v4136_v46  ;;  %v1143_v8 = vmul.f32 %v962_v63, %v962_v63  ;;  %v4139_v9 = vpop.f32.mrb[70].mxu0 }
 0x1be   : > { %v966_v32 = vpop.f32.mrb[71].mxu0 }
 0x1bf   : > { %v4142_v60 = vadd.f32 %v3988_v21, %v1063_v27  ;;  %v4145_v37 = vadd.f32 %v3990_v23, %v1143_v8  ;;  %v1064_v16 = vmul.f32 %v966_v32, %v4139_v9  ;;  %v1144_v7 = vmul.f32 %v966_v32, %v966_v32 }
 0x1c1   : > { %3285 = vrsqrt.f32 %v4145_v37  ;;  %v4150_v10 = vadd.f32 %v3994_v35, %v1064_v16  ;;  %v4153_v38 = vadd.f32 %v3996_v26, %v1144_v7  ;;  %v1194_v16 = vand.u32 2147483648, %v1158_v1  ;;  %v564_v7 = vld [vmem:[%s4158_s24] sm:$0xff] }
 0x1c2   : > { %v628_v43 = vpack.c.bf16 %v565_v61, %v564_v7  ;;  %vm1205_vm4 = vcmp.eq.f32.partialorder %v4145_v37, inf  ;;  %vm1207_vm5 = vcmp.eq.f32.partialorder %v4145_v37, 0.0 }
 0x1c3   : > { %v3282_v21 = vpop.eup %3281  ;;  %3287 = vrsqrt.f32 %v4153_v38  ;;  %v4161_v23 = vpop.f32.mrb[72].mxu0  ;;  %vm1212_vm6 = vcmp.eq.f32.partialorder %v4153_v38, inf  ;;  %vm1214_vm7 = vcmp.eq.f32.partialorder %v4153_v38, 0.0 }
 0x1c4   : > { %4856 = vst [vmem:[#allocation34_spill] sm:$0xff] %v4161_v23  ;;  %v972_v63 = vpop.f32.mrb[73].mxu0  ;;  %v1190_v27 = vmul.f32 %v3282_v21, %v1158_v1 }
 0x1c5   : > { %v3284_v35 = vpop.eup %3283  ;;  %v1065_v8 = vmul.f32 %v972_v63, %v4161_v23  ;;  %v1145_v26 = vmul.f32 %v972_v63, %v972_v63  ;;  %v4164_v32 = vpop.f32.mrb[74].mxu0 }
 0x1c6   : > { %v976_v51 = vpop.f32.mrb[75].mxu0  ;;  %v1192_v30 = vsel %vm1191_vm0, %v1158_v1, %v1190_v27  ;;  %v1197_v47 = vmul.f32 %v3284_v35, %v1160_v53 }
 0x1c7   : > { %v4169_v44 = vadd.f32 %v4011_v13, %v1065_v8  ;;  %v4172_v21 = vadd.f32 %v4013_v17, %v1145_v26  ;;  %v1066_v12 = vmul.f32 %v976_v51, %v4164_v32  ;;  %v1146_v63 = vmul.f32 %v976_v51, %v976_v51  ;;  %v3249_v17 = vld [vmem:[%s4794_s5] ss:$12 sps:$4 sm:$0xff]   ;;  %v567_v8 = vld [vmem:[%s4158_s24 + $0x18] sm:$0xff] }
 0x1c8   : > { %v1195_v39 = vsel %vm1193_vm1, %v1194_v16, %v1192_v30  ;;  %v1199_v23 = vsel %vm1198_vm2, %v1160_v53, %v1197_v47  ;;  %v1208_v53 = vand.u32 2147483648, %v4145_v37 }
 0x1c9   : > { %3289 = vrsqrt.f32 %v4172_v21  ;;  %v4177_v1 = vadd.f32 %v4017_v50, %v1066_v12  ;;  %v4180_v27 = vadd.f32 %v4019_v33, %v1146_v63  ;;  %v1202_v13 = vsel %vm1200_vm3, %v1201_v5, %v1199_v23  ;;  %v3254_v12 = vld [vmem:[%s4794_s5 + $0x1c] ss:$12 sps:$4 sm:$0xff]   ;;  %v566_v23 = vld [vmem:[%s4158_s24 + $0x10] sm:$0xff] }
 0x1ca   : > { %v1301_v35 = vpack.c.bf16 %v1202_v13, %v1195_v39  ;;  %v1215_v63 = vand.u32 2147483648, %v4153_v38  ;;  %vm1219_vm8 = vcmp.eq.f32.partialorder %v4172_v21, inf  ;;  %vm1221_vm9 = vcmp.eq.f32.partialorder %v4172_v21, 0.0 }
 0x1cb   : > { %v3286_v51 = vpop.eup %3285  ;;  %3291 = vrsqrt.f32 %v4180_v27  ;;  %v4186_v47 = vpop.f32.mrb[76].mxu0  ;;  %vm1226_vm10 = vcmp.eq.f32.partialorder %v4180_v27, inf  ;;  %vm1228_vm11 = vcmp.eq.f32.partialorder %v4180_v27, 0.0 }
 0x1cc   : > { %v982_v50 = vpop.f32.mrb[77].mxu0  ;;  %1476 = vmatprep.mubr.bf16.mxu1 %v1301_v35  ;;  %v1204_v5 = vmul.f32 %v3286_v51, %v4145_v37 }
 0x1cd   : > { %v3288_v39 = vpop.eup %3287  ;;  %v1067_v33 = vmul.f32 %v982_v50, %v4186_v47  ;;  %v1147_v30 = vmul.f32 %v982_v50, %v982_v50  ;;  %v4194_v61 = vpop.f32.mrb[78].mxu0  ;;  %1477 = vmatmul.mubr.bf16.vlgmr.msra.gmra.mrb[0].mxu1 %v628_v43  ;;  %v3252_v43 = vld [vmem:[%s4794_s5 + $0x18] ss:$12 sps:$4 sm:$0xff]  }
 0x1ce   : > { %v986_v26 = vpop.f32.mrb[79].mxu0  ;;  %v1206_v16 = vsel %vm1205_vm4, %v4145_v37, %v1204_v5  ;;  %v1211_v7 = vmul.f32 %v3288_v39, %v4153_v38  ;;  %1839 = vmatpush1.bf16.msra.mxu1 %v3249_v17  ;;  %v3257_v5 = vld [vmem:[%s4794_s5 + $0x34] ss:$12 sps:$4 sm:$0xff]   ;;  %v3255_v37 = vld [vmem:[%s4794_s5 + $0x30] ss:$12 sps:$4 sm:$0xff]  }
 0x1cf   : > { %v4208_v13 = vadd.f32 %v4031_v41, %v1067_v33  ;;  %v4211_v35 = vadd.f32 %v4033_v31, %v1147_v30  ;;  %v1068_v51 = vmul.f32 %v986_v26, %v4194_v61  ;;  %v1148_v50 = vmul.f32 %v986_v26, %v986_v26  ;;  %1840 = vmatprep.subr.bf16.mxu1 %v3254_v12 }
 0x1d0   : > { %v1209_v17 = vsel %vm1207_vm5, %v1208_v53, %v1206_v16  ;;  %v1213_v39 = vsel %vm1212_vm6, %v4153_v38, %v1211_v7  ;;  %v629_v41 = vpack.c.bf16 %v567_v8, %v566_v23 }
 0x1d1   : > { %3293 = vrsqrt.f32 %v4211_v35  ;;  %v4223_v31 = vadd.f32 %v4037_v25, %v1068_v51  ;;  %v4226_v33 = vadd.f32 %v4039_v45, %v1148_v50  ;;  %v1216_v12 = vsel %vm1214_vm7, %v1215_v63, %v1213_v39  ;;  %v3260_v25 = vld [vmem:[%s4794_s5 + $0x4c] ss:$12 sps:$4 sm:$0xff]  }
 0x1d2   : > { %v1302_v30 = vpack.c.bf16 %v1216_v12, %v1209_v17  ;;  %1841 = vmatpush1.bf16.msra.mxu1 %v3252_v43  ;;  %v1222_v63 = vand.u32 2147483648, %v4172_v21  ;;  %v568_v43 = vld [vmem:[%s4158_s24 + $0x20] sm:$0xff]  ;;  %v569_v51 = vld [vmem:[%s4158_s24 + $0x28] sm:$0xff]  ;;  %v1229_v39 = vand.u32 2147483648, %v4180_v27  ;;  %vm1233_vm12 = vcmp.eq.f32.partialorder %v4211_v35, inf }
 0x1d3   : > { %v3290_v53 = vpop.eup %3289  ;;  %3295 = vrsqrt.f32 %v4226_v33  ;;  %v4232_v38 = vpop.f32.mrb[80].mxu0  ;;  %1842 = vmatprep.subr.bf16.mxu1 %v3257_v5  ;;  %vm1235_vm13 = vcmp.eq.f32.partialorder %v4211_v35, 0.0  ;;  %vm1240_vm14 = vcmp.eq.f32.partialorder %v4226_v33, inf  ;;  %vm1242_vm15 = vcmp.eq.f32.partialorder %v4226_v33, 0.0 }
 0x1d4   : > { %v992_v45 = vpop.f32.mrb[81].mxu0  ;;  %1484 = vmatprep.mubr.bf16.mxu1 %v1302_v30  ;;  %v1218_v23 = vmul.f32 %v3290_v53, %v4172_v21 }
 0x1d5   : > { %v3292_v8 = vpop.eup %3291  ;;  %v1069_v26 = vmul.f32 %v992_v45, %v4232_v38  ;;  %v1149_v16 = vmul.f32 %v992_v45, %v992_v45  ;;  %v4240_v7 = vpop.f32.mrb[82].mxu0  ;;  %1485 = vmatmul.mubr.bf16.gmra.mrb[4].mxu1 %v629_v41  ;;  %v3258_v41 = vld [vmem:[%s4794_s5 + $0x48] ss:$12 sps:$4 sm:$0xff]  }
 0x1d6   : > { %v996_v50 = vpop.f32.mrb[83].mxu0  ;;  %v1220_v5 = vsel %vm1219_vm8, %v4172_v21, %v1218_v23  ;;  %v1225_v17 = vmul.f32 %v3292_v8, %v4180_v27  ;;  %1843 = vmatpush1.bf16.msra.mxu1 %v3255_v37  ;;  %v630_v37 = vpack.c.bf16 %v569_v51, %v568_v43 }
 0x1d7   : > { %v4254_v12 = vadd.f32 %v4051_v49, %v1069_v26  ;;  %v4257_v30 = vadd.f32 %v4053_v28, %v1149_v16  ;;  %v1070_v53 = vmul.f32 %v996_v50, %v4240_v7  ;;  %v1150_v45 = vmul.f32 %v996_v50, %v996_v50  ;;  %1844 = vmatprep.subr.bf16.mxu1 %v3260_v25 }
 0x1d8   : > { %v1223_v23 = vsel %vm1221_vm9, %v1222_v63, %v1220_v5  ;;  %v1227_v8 = vsel %vm1226_vm10, %v4180_v27, %v1225_v17  ;;  %v1236_v50 = vand.u32 2147483648, %v4211_v35  ;;  %v570_v5 = vld [vmem:[%s4158_s24 + $0x30] sm:$0xff]  ;;  %v571_v17 = vld [vmem:[%s4158_s24 + $0x38] sm:$0xff] }
 0x1d9   : > { %3297 = vrsqrt.f32 %v4257_v30  ;;  %v4266_v49 = vadd.f32 %v4057_v36, %v1070_v53  ;;  %v4269_v28 = vadd.f32 %v4059_v52, %v1150_v45  ;;  %v1230_v26 = vsel %vm1228_vm11, %v1229_v39, %v1227_v8 }
 0x1da   : > { %v1303_v16 = vpack.c.bf16 %v1230_v26, %v1223_v23  ;;  %1845 = vmatpush1.bf16.msra.mxu1 %v3258_v41  ;;  %v1243_v45 = vand.u32 2147483648, %v4226_v33  ;;  %vm1247_vm0 = vcmp.eq.f32.partialorder %v4257_v30, inf  ;;  %vm1249_vm1 = vcmp.eq.f32.partialorder %v4257_v30, 0.0 }
 0x1db   : > { %v3294_v21 = vpop.eup %3293  ;;  %3299 = vrsqrt.f32 %v4269_v28  ;;  %v4272_v25 = vpop.f32.mrb[84].mxu0  ;;  %vm1254_vm2 = vcmp.eq.f32.partialorder %v4269_v28, inf  ;;  %vm1256_vm3 = vcmp.eq.f32.partialorder %v4269_v28, 0.0 }
 0x1dc   : > { %v1002_v27 = vpop.f32.mrb[85].mxu0  ;;  %1492 = vmatprep.mubr.bf16.mxu1 %v1303_v16  ;;  %v1232_v63 = vmul.f32 %v3294_v21, %v4211_v35 }
 0x1dd   : > { %v3296_v36 = vpop.eup %3295  ;;  %v1071_v52 = vmul.f32 %v1002_v27, %v4272_v25  ;;  %v1151_v43 = vmul.f32 %v1002_v27, %v1002_v27  ;;  %v4277_v51 = vpop.f32.mrb[86].mxu0  ;;  %1493 = vmatmul.mubr.bf16.gmra.mrb[8].mxu1 %v630_v37 }
 0x1de   : > { %v1006_v39 = vpop.f32.mrb[87].mxu0  ;;  %v1234_v41 = vsel %vm1233_vm12, %v4211_v35, %v1232_v63  ;;  %v1239_v53 = vmul.f32 %v3296_v36, %v4226_v33  ;;  %v631_v35 = vpack.c.bf16 %v571_v17, %v570_v5  ;;  %v1250_v17 = vand.u32 2147483648, %v4257_v30 }
 0x1df   : > { %v4288_v23 = vadd.f32 %v4071_v56, %v1071_v52  ;;  %v4291_v8 = vadd.f32 %v4073_v40, %v1151_v43  ;;  %v1072_v37 = vmul.f32 %v1006_v39, %v4277_v51  ;;  %v1152_v26 = vmul.f32 %v1006_v39, %v1006_v39  ;;  %v572_v39 = vld [vmem:[%s4158_s24 + $0x40] sm:$0xff] }
 0x1e0   : > { %v1237_v16 = vsel %vm1235_vm13, %v1236_v50, %v1234_v41  ;;  %v1241_v21 = vsel %vm1240_vm14, %v4226_v33, %v1239_v53  ;;  %v573_v41 = vld [vmem:[%s4158_s24 + $0x48] sm:$0xff] }
 0x1e1   : > { %3301 = vrsqrt.f32 %v4291_v8  ;;  %v4298_v27 = vadd.f32 %v4077_v18, %v1072_v37  ;;  %v4301_v56 = vadd.f32 %v4079_v58, %v1152_v26  ;;  %v1244_v63 = vsel %vm1242_vm15, %v1243_v45, %v1241_v21 }
 0x1e2   : > { %v1304_v40 = vpack.c.bf16 %v1244_v63, %v1237_v16  ;;  %v1257_v26 = vand.u32 2147483648, %v4269_v28  ;;  %vm1261_vm4 = vcmp.eq.f32.partialorder %v4291_v8, inf  ;;  %vm1263_vm5 = vcmp.eq.f32.partialorder %v4291_v8, 0.0 }
 0x1e3   : > { %v3298_v36 = vpop.eup %3297  ;;  %3303 = vrsqrt.f32 %v4301_v56  ;;  %v4304_v52 = vpop.f32.mrb[88].mxu0  ;;  %vm1268_vm6 = vcmp.eq.f32.partialorder %v4301_v56, inf  ;;  %vm1270_vm7 = vcmp.eq.f32.partialorder %v4301_v56, 0.0 }
 0x1e4   : > { %4857 = vst [vmem:[#allocation35_spill] sm:$0xff] %v4304_v52  ;;  %v1012_v43 = vpop.f32.mrb[89].mxu0  ;;  %1500 = vmatprep.mubr.bf16.mxu1 %v1304_v40  ;;  %v1246_v33 = vmul.f32 %v3298_v36, %v4257_v30 }
 0x1e5   : > { %v3300_v18 = vpop.eup %3299  ;;  %v1073_v50 = vmul.f32 %v1012_v43, %v4304_v52  ;;  %v1153_v58 = vmul.f32 %v1012_v43, %v1012_v43  ;;  %v4309_v5 = vpop.f32.mrb[90].mxu0  ;;  %1501 = vmatmul.mubr.bf16.gmra.mrb[12].mxu1 %v631_v35  ;;  %v3280_v52 = vld [vmem:[%s4794_s5 + $0xb0] ss:$12 sps:$4 sm:$0xff]  }
 0x1e6   : > { %4858 = vst [vmem:[#allocation36_spill] sm:$0xff] %v4309_v5  ;;  %v1016_v53 = vpop.f32.mrb[91].mxu0  ;;  %v1248_v45 = vsel %vm1247_vm0, %v4257_v30, %v1246_v33  ;;  %v1253_v37 = vmul.f32 %v3300_v18, %v4269_v28  ;;  %v632_v30 = vpack.c.bf16 %v573_v41, %v572_v39 }
 0x1e7   : > { %v4320_v16 = vadd.f32 %v4091_v62, %v1073_v50  ;;  %v4323_v21 = vadd.f32 %v4093_v48, %v1153_v58  ;;  %v1074_v35 = vmul.f32 %v1016_v53, %v4309_v5  ;;  %v1154_v63 = vmul.f32 %v1016_v53, %v1016_v53  ;;  %v574_v53 = vld [vmem:[%s4158_s24 + $0x50] sm:$0xff] }
 0x1e8   : > { %v1251_v40 = vsel %vm1249_vm1, %v1250_v17, %v1248_v45  ;;  %v1255_v36 = vsel %vm1254_vm2, %v4269_v28, %v1253_v37  ;;  %v575_v45 = vld [vmem:[%s4158_s24 + $0x58] sm:$0xff] }
 0x1e9   : > { %4859 = vst [vmem:[#allocation37_spill] sm:$0xff] %v4320_v16  ;;  %3305 = vrsqrt.f32 %v4323_v21  ;;  %v4330_v43 = vadd.f32 %v4097_v20, %v1074_v35  ;;  %v1184_v62 = vadd.f32 %v4099_v0, %v1154_v63  ;;  %v1258_v33 = vsel %vm1256_vm3, %v1257_v26, %v1255_v36 }
 0x1ea   : > { %v1305_v48 = vpack.c.bf16 %v1258_v33, %v1251_v40  ;;  %v1264_v0 = vand.u32 2147483648, %v4291_v8  ;;  %v1271_v63 = vand.u32 2147483648, %v4301_v56  ;;  %vm1275_vm8 = vcmp.eq.f32.partialorder %v4323_v21, inf }
 0x1eb   : > { %4860 = vst [vmem:[#allocation38_spill] sm:$0xff] %v4330_v43  ;;  %v3302_v18 = vpop.eup %3301  ;;  %3307 = vrsqrt.f32 %v1184_v62  ;;  %v4333_v50 = vpop.f32.mrb[92].mxu0  ;;  %vm1282_vm9 = vcmp.eq.f32.partialorder %v1184_v62, inf  ;;  %vm1277_vm10 = vcmp.eq.f32.partialorder %v4323_v21, 0.0  ;;  %vm1284_vm11 = vcmp.eq.f32.partialorder %v1184_v62, 0.0 }
 0x1ec   : > { %4861 = vst [vmem:[#allocation39_spill] sm:$0xff] %v4333_v50  ;;  %v1022_v58 = vpop.f32.mrb[93].mxu0  ;;  %1508 = vmatprep.mubr.bf16.mxu1 %v1305_v48  ;;  %v1260_v28 = vmul.f32 %v3302_v18, %v4291_v8 }
 0x1ed   : > { %v3304_v17 = vpop.eup %3303  ;;  %v1075_v20 = vmul.f32 %v1022_v58, %v4333_v50  ;;  %v1155_v39 = vmul.f32 %v1022_v58, %v1022_v58  ;;  %v4338_v41 = vpop.f32.mrb[94].mxu0  ;;  %1509 = vmatmul.mubr.bf16.gmra.mrb[16].mxu1 %v632_v30 }
 0x1ee   : > { %4862 = vst [vmem:[#allocation40_spill] sm:$0xff] %v4338_v41  ;;  %v1026_v37 = vpop.f32.mrb[95].mxu0  ;;  %v1262_v26 = vsel %vm1261_vm4, %v4291_v8, %v1260_v28  ;;  %v1267_v35 = vmul.f32 %v3304_v17, %v4301_v56  ;;  %v633_v8 = vpack.c.bf16 %v575_v45, %v574_v53  ;;  %v576_v53 = vld [vmem:[%s4158_s24 + $0x60] sm:$0xff]  ;;  %v577_v45 = vld [vmem:[%s4158_s24 + $0x68] sm:$0xff] }
 0x1ef   : > { %v4349_v40 = vadd.f32 %v4111_v4, %v1075_v20  ;;  %v1186_v36 = vadd.f32 %v4113_v55, %v1155_v39  ;;  %v1076_v30 = vmul.f32 %v1026_v37, %v4338_v41  ;;  %v1156_v33 = vmul.f32 %v1026_v37, %v1026_v37 }
 0x1f0   : > { %v1265_v48 = vsel %vm1263_vm5, %v1264_v0, %v1262_v26  ;;  %v1269_v18 = vsel %vm1268_vm6, %v4301_v56, %v1267_v35 }
 0x1f1   : > { %4863 = vst [vmem:[#allocation41_spill] sm:$0xff] %v4349_v40  ;;  %3309 = vrsqrt.f32 %v1186_v36  ;;  %v4356_v58 = vadd.f32 %v4117_v59, %v1076_v30  ;;  %v1188_v4 = vadd.f32 %v4119_v6, %v1156_v33  ;;  %v1272_v28 = vsel %vm1270_vm7, %v1271_v63, %v1269_v18 }
 0x1f2   : > { %v1306_v17 = vpack.c.bf16 %v1272_v28, %v1265_v48  ;;  %v1278_v59 = vand.u32 2147483648, %v4323_v21  ;;  %v1285_v6 = vand.u32 2147483648, %v1184_v62  ;;  %v634_v63 = vpack.c.bf16 %v577_v45, %v576_v53 }
 0x1f3   : > { %4864 = vst [vmem:[#allocation42_spill] sm:$0xff] %v4356_v58  ;;  %v3306_v55 = vpop.eup %3305  ;;  %3311 = vrsqrt.f32 %v1188_v4  ;;  %vm1289_vm12 = vcmp.eq.f32.partialorder %v1186_v36, inf  ;;  %vm1296_vm13 = vcmp.eq.f32.partialorder %v1188_v4, inf  ;;  %vm1291_vm14 = vcmp.eq.f32.partialorder %v1186_v36, 0.0 }
 0x1f4   : > { %1516 = vmatprep.mubr.bf16.mxu1 %v1306_v17  ;;  %v1274_v20 = vmul.f32 %v3306_v55, %v4323_v21  ;;  %v578_v17 = vld [vmem:[%s4158_s24 + $0x70] sm:$0xff]  ;;  %v579_v55 = vld [vmem:[%s4158_s24 + $0x78] sm:$0xff]  ;;  %vm1298_vm15 = vcmp.eq.f32.partialorder %v1188_v4, 0.0  ;;  %v4865_v45 = vmov 0   ;;  %s4682_s24 = scalar_lea.vmem [#allocation3], %s2630_s18  ;;  %s3383_s18 = scalar_lea.vmem %s3382_s13, 2048 }
 0x1f5   : > { %v3308_v39 = vpop.eup %3307  ;;  %1517 = vmatmul.mubr.bf16.gmra.mrb[20].mxu1 %v633_v8  ;;  %s2467_s20 = sshll.u32 %s4682_s24, 4  ;;  %s4723_s20 = int_to_ptr.vmem [resolvable:$true] %s2467_s20 }
 0x1f6   : > { %v1276_v56 = vsel %vm1275_vm8, %v4323_v21, %v1274_v20  ;;  %v1281_v0 = vmul.f32 %v3308_v39, %v1184_v62  ;;  %v1292_v20 = vand.u32 2147483648, %v1186_v36  ;;  %v1299_v21 = vand.u32 2147483648, %v1188_v4  ;;  %s3377_s10 = scalar_lea.vmem %s4723_s20, 1024  ;;  %p3384_p3 = scmp.lt.s32.totalorder %s4723_s20, %s3382_s13 }
 0x1f7   : > { %v1279_v26 = vsel %vm1277_vm10, %v1278_v59, %v1276_v56  ;;  %v3263_v59 = vld [vmem:[%s4794_s5 + $0x64] ss:$12 sps:$4 sm:$0xff]   ;;  %p3378_p0 = scmp.ne.s32.totalorder %s4723_s20, %s3377_s10  ;;  %p3385_p4 = scmp.lt.s32.totalorder %s3383_s18, %s3377_s10 }
 0x1f8   : > { %v1283_v37 = vsel %vm1282_vm9, %v1184_v62, %v1281_v0  ;;  %v635_v0 = vpack.c.bf16 %v579_v55, %v578_v17  ;;  %1846 = vmatprep.subr.bf16.mxu1 %v3263_v59 }
 0x1f9   : > { %v1286_v35 = vsel %vm1284_vm11, %v1285_v6, %v1283_v37  ;;  %v3261_v6 = vld [vmem:[%s4794_s5 + $0x60] ss:$12 sps:$4 sm:$0xff]   ;;  %p3379_p1 = pnand %p3378_p0, %p3540_p6  ;;  %p3386_p5 = por %p3385_p4, %p3384_p3 }
 0x1fa   : > { %v1307_v30 = vpack.c.bf16 %v1286_v35, %v1279_v26  ;;  %1847 = vmatpush1.bf16.msra.mxu1 %v3261_v6  ;;  %v3269_v37 = vld [vmem:[%s4794_s5 + $0x94] ss:$12 sps:$4 sm:$0xff]   ;;  %v3267_v26 = vld [vmem:[%s4794_s5 + $0x90] ss:$12 sps:$4 sm:$0xff]   ;;  %v3272_v35 = vld [vmem:[%s4794_s5 + $0xac] ss:$12 sps:$4 sm:$0xff]  }
 0x1fb   : > { %v3310_v33 = vpop.eup %3309  ;;  %p3380_p2 = pneg %p3379_p1 }
 0x1fc   : > { %1524 = vmatprep.mubr.bf16.mxu1 %v1307_v30  ;;  %v1288_v48 = vmul.f32 %v3310_v33, %v1186_v36  ;;  %v4396_v30 = vld [vmem:[%s4794_s5 + $0x8] ss:$12 sps:$4 sm:$0xff]  }
 0x1fd   : > { %v3312_v18 = vpop.eup %3311  ;;  %1525 = vmatmul.mubr.bf16.gmra.mrb[24].mxu1 %v634_v63  ;;  %v3270_v63 = vld [vmem:[%s4794_s5 + $0xa8] ss:$12 sps:$4 sm:$0xff]   ;;  %p3387_p7 = pnand %p3386_p5, %p3380_p2 }
 0x1fe   : > { %v1290_v8 = vsel %vm1289_vm12, %v1186_v36, %v1288_v48  ;;  %v1295_v28 = vmul.f32 %v3312_v18, %v1188_v4  ;;  %v3266_v36 = vld [vmem:[%s4794_s5 + $0x7c] ss:$12 sps:$4 sm:$0xff]   ;;  %v4402_v48 = vld [vmem:[%s4793_s4] ss:$0 sm:$0xff] }
 0x1ff   : > { %v1293_v62 = vsel %vm1291_vm14, %v1292_v20, %v1290_v8  ;;  %1848 = vmatprep.subr.bf16.mxu1 %v3266_v36 }
 0x200   : > { %v1297_v39 = vsel %vm1296_vm13, %v1188_v4, %v1295_v28  ;;  %v3264_v4 = vld [vmem:[%s4794_s5 + $0x78] ss:$12 sps:$4 sm:$0xff]  }
 0x201   : > { %v1300_v56 = vsel %vm1298_vm15, %v1299_v21, %v1297_v39  ;;  %1849 = vmatpush1.bf16.msra.mxu1 %v3264_v4 }
 0x202   : > { %v1308_v53 = vpack.c.bf16 %v1300_v56, %v1293_v62  ;;  %1850 = vmatprep.subr.bf16.mxu1 %v3269_v37 }
 0x204   : > { %1532 = vmatprep.mubr.bf16.mxu1 %v1308_v53 }
 0x205   : > { %1533 = vmatmul.mubr.bf16.gmra.mrb[28].mxu1 %v635_v0 }
 0x206   : > { %1870 = vmatprep.mubr.bf16.mxu1 %v4865_v45  ;;  %1851 = vmatpush1.bf16.msra.mxu1 %v3267_v26 }
 0x207   : > { %1852 = vmatprep.subr.bf16.mxu1 %v3272_v35 }
 0x20a   : > { %1853 = vmatpush1.bf16.msra.mxu1 %v3270_v63 }
 0x20b   : > { %3114 = vmatprep.subr.bf16.mxu1 %v4396_v30 }
 0x2a0   : > { %v3050_v33 = vpop.f32.mrb[0].mxu1 }
 0x2a1   : > { %v3051_v18 = vpop.f32.mrb[1].mxu1 }
 0x2a2   : > { %v3052_v8 = vadd.f32 %v3051_v18, %v3050_v33  ;;  %v3053_v28 = vpop.f32.mrb[2].mxu1 }
 0x2a3   : > { %v3054_v17 = vpop.f32.mrb[3].mxu1 }
 0x2a4   : > { %v1479_v55 = vadd.f32 %v3052_v8, %v4402_v48  ;;  %v3055_v20 = vadd.f32 %v3054_v17, %v3053_v28 }
 0x2a6   : > { %v2666_v21 = vmul.f32 -1.442695, %v1479_v55  ;;  %v1482_v39 = vadd.f32 %v3055_v20, %v4402_v48 }
 0x2a8   : > { %3313 = vpow2.f32 %v2666_v21  ;;  %v2667_v62 = vmul.f32 -1.442695, %v1482_v39  ;;  %v3056_v56 = vpop.f32.mrb[4].mxu1 }
 0x2a9   : > { %v3057_v0 = vpop.f32.mrb[5].mxu1 }
 0x2aa   : > { %3315 = vpow2.f32 %v2667_v62  ;;  %v3058_v53 = vadd.f32 %v3057_v0, %v3056_v56  ;;  %v3059_v59 = vpop.f32.mrb[6].mxu1 }
 0x2ab   : > { %v3060_v6 = vpop.f32.mrb[7].mxu1 }
 0x2ac   : > { %v4407_v36 = vadd.f32 %v3058_v53, %v4402_v48  ;;  %v3061_v4 = vadd.f32 %v3060_v6, %v3059_v59 }
 0x2ae   : > { %v2668_v37 = vmul.f32 -1.442695, %v4407_v36  ;;  %v4411_v26 = vadd.f32 %v3061_v4, %v4402_v48 }
 0x2b0   : > { %3317 = vpow2.f32 %v2668_v37  ;;  %v2669_v35 = vmul.f32 -1.442695, %v4411_v26  ;;  %v3062_v63 = vpop.f32.mrb[8].mxu1 }
 0x2b1   : > { %v3063_v33 = vpop.f32.mrb[9].mxu1 }
 0x2b2   : > { %v3314_v18 = vpop.eup %3313  ;;  %3319 = vpow2.f32 %v2669_v35  ;;  %v3064_v8 = vadd.f32 %v3063_v33, %v3062_v63  ;;  %v3065_v28 = vpop.f32.mrb[10].mxu1 }
 0x2b3   : > { %v1589_v17 = vadd.f32 1.0, %v3314_v18  ;;  %v3066_v20 = vpop.f32.mrb[11].mxu1 }
 0x2b4   : > { %v3316_v21 = vpop.eup %3315  ;;  %v4415_v62 = vadd.f32 %v3064_v8, %v4402_v48  ;;  %v3067_v56 = vadd.f32 %v3066_v20, %v3065_v28 }
 0x2b5   : > { %3321 = vrcp.f32 %v1589_v17  ;;  %v1590_v0 = vadd.f32 1.0, %v3316_v21 }
 0x2b6   : > { %v2670_v53 = vmul.f32 -1.442695, %v4415_v62  ;;  %v4419_v59 = vadd.f32 %v3067_v56, %v4402_v48 }
 0x2b7   : > { %3323 = vrcp.f32 %v1590_v0 }
 0x2b8   : > { %3325 = vpow2.f32 %v2670_v53  ;;  %v2671_v6 = vmul.f32 -1.442695, %v4419_v59  ;;  %v3068_v4 = vpop.f32.mrb[12].mxu1 }
 0x2b9   : > { %v3069_v37 = vpop.f32.mrb[13].mxu1 }
 0x2ba   : > { %v3318_v35 = vpop.eup %3317  ;;  %3327 = vpow2.f32 %v2671_v6  ;;  %v3070_v63 = vadd.f32 %v3069_v37, %v3068_v4  ;;  %v3071_v33 = vpop.f32.mrb[14].mxu1 }
 0x2bb   : > { %v1591_v18 = vadd.f32 1.0, %v3318_v35  ;;  %v3072_v8 = vpop.f32.mrb[15].mxu1 }
 0x2bc   : > { %v3320_v28 = vpop.eup %3319  ;;  %v4423_v17 = vadd.f32 %v3070_v63, %v4402_v48  ;;  %v3073_v20 = vadd.f32 %v3072_v8, %v3071_v33 }
 0x2bd   : > { %3329 = vrcp.f32 %v1591_v18  ;;  %v1592_v21 = vadd.f32 1.0, %v3320_v28 }
 0x2be   : > { %v2672_v56 = vmul.f32 -1.442695, %v4423_v17  ;;  %v4427_v0 = vadd.f32 %v3073_v20, %v4402_v48 }
 0x2bf   : > { %v3322_v53 = vpop.eup %3321  ;;  %3331 = vrcp.f32 %v1592_v21 }
 0x2c0   : > { %3333 = vpow2.f32 %v2672_v56  ;;  %v2673_v6 = vmul.f32 -1.442695, %v4427_v0  ;;  %v3074_v4 = vpop.f32.mrb[16].mxu1  ;;  %v1637_v41 = vmul.f32 %v3322_v53, %v1479_v55  ;;  %v3274_v56 = vld [vmem:[%s4794_s5 + $0x20] ss:$12 sps:$4 sm:$0xff]  }
 0x2c1   : > { %v3324_v37 = vpop.eup %3323  ;;  %v3075_v35 = vpop.f32.mrb[17].mxu1 }
 0x2c2   : > { %v3326_v58 = vpop.eup %3325  ;;  %v1638_v63 = vmul.f32 %v3324_v37, %v1482_v39  ;;  %3335 = vpow2.f32 %v2673_v6  ;;  %v3076_v33 = vadd.f32 %v3075_v35, %v3074_v4  ;;  %v3077_v18 = vpop.f32.mrb[18].mxu1 }
 0x2c3   : > { %v1593_v8 = vadd.f32 1.0, %v3326_v58  ;;  %v3078_v28 = vpop.f32.mrb[19].mxu1 }
 0x2c4   : > { %v3328_v40 = vpop.eup %3327  ;;  %v4430_v50 = vpack.c.bf16 %v1638_v63, %v1637_v41  ;;  %v4433_v20 = vadd.f32 %v3076_v33, %v4402_v48  ;;  %v3079_v21 = vadd.f32 %v3078_v28, %v3077_v18 }
 0x2c5   : > { %3337 = vrcp.f32 %v1593_v8  ;;  %v1594_v43 = vadd.f32 1.0, %v3328_v40  ;;  %v3275_v40 = vld [vmem:[%s4794_s5 + $0x38] ss:$12 sps:$4 sm:$0xff]  }
 0x2c6   : > { %v2674_v55 = vmul.f32 -1.442695, %v4433_v20  ;;  %v4440_v39 = vadd.f32 %v3079_v21, %v4402_v48  ;;  %1871 = vmatmul.mubr.bf16.vlgmr.msra.gmra.mrb[32].mxu1 %v4430_v50 }
 0x2c7   : > { %v3330_v58 = vpop.eup %3329  ;;  %3339 = vrcp.f32 %v1594_v43  ;;  %3115 = vmatpush3.bf16.msra.mxu1 %v4396_v30  ;;  %1880 = vmatprep.mubr.bf16.mxu1 %v4865_v45 }
 0x2c8   : > { %3341 = vpow2.f32 %v2674_v55  ;;  %v2675_v41 = vmul.f32 -1.442695, %v4440_v39  ;;  %v3080_v53 = vpop.f32.mrb[20].mxu1  ;;  %3116 = vmatprep.subr.bf16.mxu1 %v3274_v56  ;;  %v1639_v35 = vmul.f32 %v3330_v58, %v4407_v36  ;;  %v3276_v36 = vld [vmem:[%s4794_s5 + $0x50] ss:$12 sps:$4 sm:$0xff]  }
 0x2c9   : > { %v3332_v6 = vpop.eup %3331  ;;  %v3081_v4 = vpop.f32.mrb[21].mxu1 }
 0x2ca   : > { %v3334_v37 = vpop.eup %3333  ;;  %v1640_v43 = vmul.f32 %v3332_v6, %v4411_v26  ;;  %3343 = vpow2.f32 %v2675_v41  ;;  %v3082_v30 = vadd.f32 %v3081_v4, %v3080_v53  ;;  %v3083_v63 = vpop.f32.mrb[22].mxu1  ;;  %v3277_v4 = vld [vmem:[%s4794_s5 + $0x68] ss:$12 sps:$4 sm:$0xff]  }
 0x2cb   : > { %v1595_v33 = vadd.f32 1.0, %v3334_v37  ;;  %v3084_v18 = vpop.f32.mrb[23].mxu1  ;;  %3117 = vmatpush3.bf16.msra.mxu1 %v3274_v56 }
 0x2cc   : > { %v3336_v8 = vpop.eup %3335  ;;  %v4452_v28 = vadd.f32 %v3082_v30, %v4402_v48  ;;  %v3085_v21 = vadd.f32 %v3084_v18, %v3083_v63  ;;  %v4454_v55 = vpack.c.bf16 %v1640_v43, %v1639_v35  ;;  %3118 = vmatprep.subr.bf16.mxu1 %v3275_v40 }
 0x2cd   : > { %3345 = vrcp.f32 %v1595_v33  ;;  %v1596_v26 = vadd.f32 1.0, %v3336_v8 }
 0x2ce   : > { %v2676_v58 = vmul.f32 -1.442695, %v4452_v28  ;;  %v4461_v41 = vadd.f32 %v3085_v21, %v4402_v48  ;;  %1881 = vmatmul.mubr.bf16.gmra.mrb[36].mxu1 %v4454_v55 }
 0x2cf   : > { %v3338_v56 = vpop.eup %3337  ;;  %3347 = vrcp.f32 %v1596_v26  ;;  %1890 = vmatprep.mubr.bf16.mxu1 %v4865_v45  ;;  %3119 = vmatpush3.bf16.msra.mxu1 %v3275_v40 }
 0x2d0   : > { %3349 = vpow2.f32 %v2676_v58  ;;  %v2677_v53 = vmul.f32 -1.442695, %v4461_v41  ;;  %v3086_v6 = vpop.f32.mrb[24].mxu1  ;;  %3120 = vmatprep.subr.bf16.mxu1 %v3276_v36  ;;  %v1641_v30 = vmul.f32 %v3338_v56, %v4415_v62  ;;  %v3278_v62 = vld [vmem:[%s4794_s5 + $0x80] ss:$12 sps:$4 sm:$0xff]  }
 0x2d1   : > { %v3340_v37 = vpop.eup %3339  ;;  %v3087_v35 = vpop.f32.mrb[25].mxu1 }
 0x2d2   : > { %v3342_v43 = vpop.eup %3341  ;;  %v1642_v63 = vmul.f32 %v3340_v37, %v4419_v59  ;;  %3351 = vpow2.f32 %v2677_v53  ;;  %v3088_v33 = vadd.f32 %v3087_v35, %v3086_v6  ;;  %v3089_v18 = vpop.f32.mrb[26].mxu1  ;;  %v3279_v35 = vld [vmem:[%s4794_s5 + $0x98] ss:$12 sps:$4 sm:$0xff]  }
 0x2d3   : > { %v1597_v40 = vadd.f32 1.0, %v3342_v43  ;;  %v3090_v8 = vpop.f32.mrb[27].mxu1  ;;  %3121 = vmatpush3.bf16.msra.mxu1 %v3276_v36 }
 0x2d4   : > { %v3344_v21 = vpop.eup %3343  ;;  %v4472_v26 = vadd.f32 %v3088_v33, %v4402_v48  ;;  %v3091_v58 = vadd.f32 %v3090_v8, %v3089_v18  ;;  %v4474_v5 = vpack.c.bf16 %v1642_v63, %v1641_v30  ;;  %3122 = vmatprep.subr.bf16.mxu1 %v3277_v4 }
 0x2d5   : > { %3353 = vrcp.f32 %v1597_v40  ;;  %v1598_v59 = vadd.f32 1.0, %v3344_v21 }
 0x2d6   : > { %v2678_v56 = vmul.f32 -1.442695, %v4472_v26  ;;  %v4481_v53 = vadd.f32 %v3091_v58, %v4402_v48  ;;  %1891 = vmatmul.mubr.bf16.gmra.mrb[40].mxu1 %v4474_v5 }
 0x2d7   : > { %v3346_v36 = vpop.eup %3345  ;;  %3355 = vrcp.f32 %v1598_v59  ;;  %1900 = vmatprep.mubr.bf16.mxu1 %v4865_v45  ;;  %3123 = vmatpush3.bf16.msra.mxu1 %v3277_v4 }
 0x2d8   : > { %3357 = vpow2.f32 %v2678_v56  ;;  %v2679_v6 = vmul.f32 -1.442695, %v4481_v53  ;;  %v3092_v37 = vpop.f32.mrb[28].mxu1  ;;  %3124 = vmatprep.subr.bf16.mxu1 %v3278_v62  ;;  %v1643_v33 = vmul.f32 %v3346_v36, %v4423_v17 }
 0x2d9   : > { %v3348_v43 = vpop.eup %3347  ;;  %v3093_v30 = vpop.f32.mrb[29].mxu1 }
 0x2da   : > { %v3350_v63 = vpop.eup %3349  ;;  %v1644_v18 = vmul.f32 %v3348_v43, %v4427_v0  ;;  %3359 = vpow2.f32 %v2679_v6  ;;  %v3094_v40 = vadd.f32 %v3093_v30, %v3092_v37  ;;  %v3095_v8 = vpop.f32.mrb[30].mxu1 }
 0x2db   : > { %v1599_v4 = vadd.f32 1.0, %v3350_v63  ;;  %v3096_v21 = vpop.f32.mrb[31].mxu1  ;;  %3125 = vmatpush3.bf16.msra.mxu1 %v3278_v62 }
 0x2dc   : > { %v3352_v58 = vpop.eup %3351  ;;  %v1535_v59 = vadd.f32 %v3094_v40, %v4402_v48  ;;  %v3097_v56 = vadd.f32 %v3096_v21, %v3095_v8  ;;  %v1656_v16 = vpack.c.bf16 %v1644_v18, %v1643_v33  ;;  %3126 = vmatprep.subr.bf16.mxu1 %v3279_v35 }
 0x2dd   : > { %3361 = vrcp.f32 %v1599_v4  ;;  %v1600_v17 = vadd.f32 1.0, %v3352_v58 }
 0x2de   : > { %v2680_v36 = vmul.f32 -1.442695, %v1535_v59  ;;  %v1538_v0 = vadd.f32 %v3097_v56, %v4402_v48  ;;  %1901 = vmatmul.mubr.bf16.gmra.mrb[44].mxu1 %v1656_v16 }
 0x2df   : > { %v3354_v6 = vpop.eup %3353  ;;  %3363 = vrcp.f32 %v1600_v17  ;;  %1910 = vmatprep.mubr.bf16.mxu1 %v4865_v45  ;;  %3127 = vmatpush3.bf16.msra.mxu1 %v3279_v35 }
 0x2e0   : > { %3365 = vpow2.f32 %v2680_v36  ;;  %v2681_v62 = vmul.f32 -1.442695, %v1538_v0  ;;  %3128 = vmatprep.subr.bf16.mxu1 %v3280_v52  ;;  %v1645_v30 = vmul.f32 %v3354_v6, %v4433_v20 }
 0x2e1   : > { %v3356_v37 = vpop.eup %3355 }
 0x2e2   : > { %v3358_v43 = vpop.eup %3357  ;;  %v1646_v63 = vmul.f32 %v3356_v37, %v4440_v39  ;;  %3367 = vpow2.f32 %v2681_v62 }
 0x2e3   : > { %v1601_v33 = vadd.f32 1.0, %v3358_v43  ;;  %3129 = vmatpush3.bf16.msra.mxu1 %v3280_v52 }
 0x2e4   : > { %v3360_v18 = vpop.eup %3359  ;;  %v1657_v48 = vpack.c.bf16 %v1646_v63, %v1645_v30 }
 0x2e5   : > { %3369 = vrcp.f32 %v1601_v33  ;;  %v1602_v40 = vadd.f32 1.0, %v3360_v18 }
 0x2e6   : > { %1911 = vmatmul.mubr.bf16.gmra.mrb[48].mxu1 %v1657_v48 }
 0x2e7   : > { %v3362_v8 = vpop.eup %3361  ;;  %3371 = vrcp.f32 %v1602_v40  ;;  %1920 = vmatprep.mubr.bf16.mxu1 %v4865_v45 }
 0x2e8   : > { %v1647_v21 = vmul.f32 %v3362_v8, %v4452_v28 }
 0x2e9   : > { %v3364_v35 = vpop.eup %3363 }
 0x2ea   : > { %v3366_v4 = vpop.eup %3365  ;;  %v1648_v20 = vmul.f32 %v3364_v35, %v4461_v41 }
 0x2eb   : > { %v1603_v58 = vadd.f32 1.0, %v3366_v4 }
 0x2ec   : > { %v3368_v39 = vpop.eup %3367  ;;  %v1658_v56 = vpack.c.bf16 %v1648_v20, %v1647_v21 }
 0x2ed   : > { %3373 = vrcp.f32 %v1603_v58  ;;  %v1604_v52 = vadd.f32 1.0, %v3368_v39 }
 0x2ee   : > { %1921 = vmatmul.mubr.bf16.gmra.mrb[52].mxu1 %v1658_v56 }
 0x2ef   : > { %v3370_v17 = vpop.eup %3369  ;;  %3375 = vrcp.f32 %v1604_v52  ;;  %1930 = vmatprep.mubr.bf16.mxu1 %v4865_v45 }
 0x2f0   : > { %v1649_v6 = vmul.f32 %v3370_v17, %v4472_v26  ;;  %v1695_v26 = vlaneseq }
 0x2f1   : > { %v3372_v36 = vpop.eup %3371 }
 0x2f2   : > { %v1650_v62 = vmul.f32 %v3372_v36, %v4481_v53  ;;  %v1696_v53 = vshrl.u32 %v1695_v26, 7 }
 0x2f4   : > { %v1659_v37 = vpack.c.bf16 %v1650_v62, %v1649_v6  ;;  %v1701_v33 = vsub.s32 1, %v1696_v53 }
 0x2f6   : > { %1931 = vmatmul.mubr.bf16.gmra.mrb[56].mxu1 %v1659_v37 }
 0x2f7   : > { %v3374_v28 = vpop.eup %3373  ;;  %1940 = vmatprep.mubr.bf16.mxu1 %v4865_v45  ;;  %v1705_v45 = vsub.s32 2, %v1696_v53 }
 0x2f8   : > { %v1651_v43 = vmul.f32 %v3374_v28, %v1535_v59  ;;  %v1693_v59 = vld [vmem:[%s4795_s6] sm:$0x7] }
 0x2f9   : > { %v3376_v41 = vpop.eup %3375 }
 0x2fa   : > { %v1652_v30 = vmul.f32 %v3376_v41, %v1538_v0  ;;  %v4512_v0 = vrot.slane %v1693_v59, %v1705_v45 }
 0x2fc   : > { %v1660_v63 = vpack.c.bf16 %v1652_v30, %v1651_v43 }
 0x2fe   : > { %1941 = vmatmul.mubr.bf16.gmra.mrb[60].mxu1 %v1660_v63 }
 0x2ff   : > { %3130 = vmatprep.mubr.bf16.mxu1 %v4430_v50  ;;  %v1697_v50 = vsub.s32 0, %v1696_v53 }
 0x306   : > { %3131 = vmatmul.mubr.bf16.vlgmr.msra.gmra.mrb[64].mxu1 %v4454_v55  ;;  %v4514_v55 = vrot.slane %v1693_v59, %v1697_v50 }
 0x307   : > { %3134 = vmatprep.mubr.bf16.mxu1 %v4474_v5  ;;  %v4516_v5 = vrot.slane %v1693_v59, %v1701_v33 }
 0x30e   : > { %3135 = vmatmul.mubr.bf16.gmra.mrb[68].mxu1 %v1656_v16 }
 0x30f   : > { %3138 = vmatprep.mubr.bf16.mxu1 %v1657_v48 }
 0x316   : > { %3139 = vmatmul.mubr.bf16.gmra.mrb[72].mxu1 %v1658_v56 }
 0x317   : > { %3142 = vmatprep.mubr.bf16.mxu1 %v1659_v37 }
 0x31e   : > { %3143 = vmatmul.mubr.bf16.gmra.mrb[76].mxu1 %v1660_v63 }
 0x399   : > { %v1872_v16 = vpop.f32.mrb[32].mxu1 }
 0x39a   : > { %v1873_v18 = vadd.f32 %v1872_v16, %v4514_v55  ;;  %v1874_v48 = vpop.f32.mrb[33].mxu1 }
 0x39b   : > { %v1875_v40 = vadd.f32 %v1874_v48, %v4516_v5  ;;  %v1876_v8 = vpop.f32.mrb[34].mxu1 }
 0x39c   : > { %v2080_v35 = vmul.f32 %v1873_v18, %v3794_v14  ;;  %v2096_v4 = vmul.f32 %v1873_v18, %v3958_v11  ;;  %v2112_v21 = vmul.f32 %v1873_v18, %v4121_v57  ;;  %v1877_v20 = vadd.f32 %v1876_v8, %v4514_v55  ;;  %v1878_v58 = vpop.f32.mrb[35].mxu1  ;;  %v4867_v18 = vld [vmem:[#allocation34_spill] sm:$0xff] }
 0x39d   : > { %v4526_v39 = vmul.f32 %v1875_v40, %v4128_v3  ;;  %v1879_v56 = vadd.f32 %v1878_v58, %v4516_v5  ;;  %v4869_v58 = vld [vmem:[#allocation23_spill] sm:$0xff] }
 0x39e   : > { %v2081_v52 = vmul.f32 %v1877_v20, %v3808_v19  ;;  %v2097_v17 = vmul.f32 %v1877_v20, %v3963_v22  ;;  %v2113_v36 = vmul.f32 %v1877_v20, %v4125_v2 }
 0x39f   : > { %v4533_v14 = vmul.f32 %v1879_v56, %v4133_v54 }
 0x3a0   : > { %v2887_v11 = vpack.c.bf16 %v2081_v52, %v2080_v35  ;;  %v2927_v6 = vpack.c.bf16 %v2097_v17, %v2096_v4  ;;  %v2967_v57 = vpack.c.bf16 %v2113_v36, %v2112_v21  ;;  %v4868_v21 = vld [vmem:[#allocation11_spill] sm:$0xff] }
 0x3a1   : > { %v1882_v62 = vpop.f32.mrb[36].mxu1 }
 0x3a2   : > { %2888 = vst [vmem:[%s4535_s17] sm:$0xff] %v2887_v11   ;;  %3018 = vst [vmem:[%s4535_s17 + $0x40] sm:$0xff] %v2927_v6   ;;  %v1883_v19 = vadd.f32 %v1882_v62, %v4514_v55  ;;  %v1884_v22 = vpop.f32.mrb[37].mxu1 }
 0x3a3   : > { %3026 = vst [vmem:[%s4535_s17 + $0x80] sm:$0xff] %v2967_v57   ;;  %v1885_v2 = vadd.f32 %v1884_v22, %v4516_v5  ;;  %v1886_v3 = vpop.f32.mrb[38].mxu1  ;;  %v4870_v22 = vld [vmem:[#allocation12_spill] sm:$0xff] }
 0x3a4   : > { %v2082_v54 = vmul.f32 %v1883_v19, %v3822_v24  ;;  %v2098_v37 = vmul.f32 %v1883_v19, %v3978_v42  ;;  %v2114_v28 = vmul.f32 %v1883_v19, %v4136_v46  ;;  %v1887_v41 = vadd.f32 %v1886_v3, %v4514_v55  ;;  %v1888_v43 = vpop.f32.mrb[39].mxu1 }
 0x3a5   : > { %v4547_v30 = vmul.f32 %v1885_v2, %v4142_v60  ;;  %v1889_v63 = vadd.f32 %v1888_v43, %v4516_v5  ;;  %v4872_v43 = vld [vmem:[#allocation13_spill] sm:$0xff] }
 0x3a6   : > { %v2083_v26 = vmul.f32 %v1887_v41, %v3836_v29  ;;  %v2099_v53 = vmul.f32 %v1887_v41, %v3983_v15  ;;  %v2115_v24 = vmul.f32 %v1887_v41, %v4139_v9  ;;  %v4866_v9 = vld [vmem:[#allocation22_spill] sm:$0xff] }
 0x3a7   : > { %v4554_v45 = vmul.f32 %v1889_v63, %v4150_v10 }
 0x3a8   : > { %v2892_v42 = vpack.c.bf16 %v2083_v26, %v2082_v54  ;;  %v2932_v59 = vpack.c.bf16 %v2099_v53, %v2098_v37  ;;  %v2972_v46 = vpack.c.bf16 %v2115_v24, %v2114_v28  ;;  %v4873_v26 = vld [vmem:[#allocation25_spill] sm:$0xff] }
 0x3a9   : > { %v1892_v50 = vpop.f32.mrb[40].mxu1 }
 0x3aa   : > { %3011 = vst [vmem:[%s4535_s17 + $0x8] sm:$0xff] %v2892_v42   ;;  %3019 = vst [vmem:[%s4535_s17 + $0x48] sm:$0xff] %v2932_v59   ;;  %v1893_v60 = vadd.f32 %v1892_v50, %v4514_v55  ;;  %v1894_v33 = vpop.f32.mrb[41].mxu1 }
 0x3ab   : > { %3027 = vst [vmem:[%s4535_s17 + $0x88] sm:$0xff] %v2972_v46   ;;  %v1895_v16 = vadd.f32 %v1894_v33, %v4516_v5  ;;  %v1896_v29 = vpop.f32.mrb[42].mxu1 }
 0x3ac   : > { %v2084_v15 = vmul.f32 %v1893_v60, %v3850_v34  ;;  %v2100_v10 = vmul.f32 %v1893_v60, %v4866_v9  ;;  %v2116_v48 = vmul.f32 %v1893_v60, %v4867_v18  ;;  %v1897_v40 = vadd.f32 %v1896_v29, %v4514_v55  ;;  %v1898_v8 = vpop.f32.mrb[43].mxu1  ;;  %v4874_v29 = vld [vmem:[#allocation14_spill] sm:$0xff] }
 0x3ad   : > { %v4566_v35 = vmul.f32 %v1895_v16, %v4169_v44  ;;  %v1899_v4 = vadd.f32 %v1898_v8, %v4516_v5  ;;  %v4876_v8 = vld [vmem:[#allocation15_spill] sm:$0xff] }
 0x3ae   : > { %v2085_v20 = vmul.f32 %v1897_v40, %v4868_v21  ;;  %v2101_v56 = vmul.f32 %v1897_v40, %v4869_v58  ;;  %v2117_v34 = vmul.f32 %v1897_v40, %v4164_v32  ;;  %v4871_v32 = vld [vmem:[#allocation24_spill] sm:$0xff]  ;;  %v4877_v21 = vld [vmem:[#allocation27_spill] sm:$0xff] }
 0x3af   : > { %v4573_v52 = vmul.f32 %v1899_v4, %v4177_v1 }
 0x3b0   : > { %v2897_v17 = vpack.c.bf16 %v2085_v20, %v2084_v15  ;;  %v2937_v36 = vpack.c.bf16 %v2101_v56, %v2100_v10  ;;  %v2977_v11 = vpack.c.bf16 %v2117_v34, %v2116_v48 }
 0x3b1   : > { %v1902_v6 = vpop.f32.mrb[44].mxu1 }
 0x3b2   : > { %3012 = vst [vmem:[%s4535_s17 + $0x10] sm:$0xff] %v2897_v17   ;;  %3020 = vst [vmem:[%s4535_s17 + $0x50] sm:$0xff] %v2937_v36   ;;  %v1903_v44 = vadd.f32 %v1902_v6, %v4514_v55  ;;  %v1904_v57 = vpop.f32.mrb[45].mxu1 }
 0x3b3   : > { %3028 = vst [vmem:[%s4535_s17 + $0x90] sm:$0xff] %v2977_v11   ;;  %v1905_v62 = vadd.f32 %v1904_v57, %v4516_v5  ;;  %v1906_v19 = vpop.f32.mrb[46].mxu1  ;;  %v4878_v57 = vld [vmem:[#allocation16_spill] sm:$0xff] }
 0x3b4   : > { %v2086_v2 = vmul.f32 %v1903_v44, %v4870_v22  ;;  %v2102_v1 = vmul.f32 %v1903_v44, %v4871_v32  ;;  %v2118_v3 = vmul.f32 %v1903_v44, %v4186_v47  ;;  %v1907_v54 = vadd.f32 %v1906_v19, %v4514_v55  ;;  %v1908_v37 = vpop.f32.mrb[47].mxu1 }
 0x3b5   : > { %v4585_v28 = vmul.f32 %v1905_v62, %v4208_v13  ;;  %v1909_v41 = vadd.f32 %v1908_v37, %v4516_v5  ;;  %v4881_v37 = vld [vmem:[#allocation29_spill] sm:$0xff] }
 0x3b6   : > { %v2087_v63 = vmul.f32 %v1907_v54, %v4872_v43  ;;  %v2103_v53 = vmul.f32 %v1907_v54, %v4873_v26  ;;  %v2119_v24 = vmul.f32 %v1907_v54, %v4194_v61  ;;  %v4875_v61 = vld [vmem:[#allocation26_spill] sm:$0xff] }
 0x3b7   : > { %v4592_v42 = vmul.f32 %v1909_v41, %v4223_v31 }
 0x3b8   : > { %v2902_v59 = vpack.c.bf16 %v2087_v63, %v2086_v2  ;;  %v2942_v46 = vpack.c.bf16 %v2103_v53, %v2102_v1  ;;  %v2982_v47 = vpack.c.bf16 %v2119_v24, %v2118_v3  ;;  %v4880_v3 = vld [vmem:[#allocation17_spill] sm:$0xff] }
 0x3b9   : > { %v1912_v50 = vpop.f32.mrb[48].mxu1 }
 0x3ba   : > { %3013 = vst [vmem:[%s4535_s17 + $0x18] sm:$0xff] %v2902_v59   ;;  %3021 = vst [vmem:[%s4535_s17 + $0x58] sm:$0xff] %v2942_v46   ;;  %v1913_v13 = vadd.f32 %v1912_v50, %v4514_v55  ;;  %v1914_v60 = vpop.f32.mrb[49].mxu1  ;;  %v4882_v50 = vld [vmem:[#allocation18_spill] sm:$0xff] }
 0x3bb   : > { %3029 = vst [vmem:[%s4535_s17 + $0x98] sm:$0xff] %v2982_v47   ;;  %v1915_v33 = vadd.f32 %v1914_v60, %v4516_v5  ;;  %v1916_v16 = vpop.f32.mrb[50].mxu1  ;;  %v4884_v60 = vld [vmem:[#allocation35_spill] sm:$0xff] }
 0x3bc   : > { %v2088_v15 = vmul.f32 %v1913_v13, %v4874_v29  ;;  %v2104_v31 = vmul.f32 %v1913_v13, %v4875_v61  ;;  %v2120_v9 = vmul.f32 %v1913_v13, %v4232_v38  ;;  %v1917_v10 = vadd.f32 %v1916_v16, %v4514_v55  ;;  %v1918_v18 = vpop.f32.mrb[51].mxu1 }
 0x3bd   : > { %v4604_v48 = vmul.f32 %v1915_v33, %v4254_v12  ;;  %v1919_v40 = vadd.f32 %v1918_v18, %v4516_v5  ;;  %v4887_v18 = vld [vmem:[#allocation31_spill] sm:$0xff] }
 0x3be   : > { %v2089_v4 = vmul.f32 %v1917_v10, %v4876_v8  ;;  %v2105_v20 = vmul.f32 %v1917_v10, %v4877_v21  ;;  %v2121_v58 = vmul.f32 %v1917_v10, %v4240_v7  ;;  %v4879_v7 = vld [vmem:[#allocation28_spill] sm:$0xff]  ;;  %v4889_v21 = vld [vmem:[#allocation38_spill] sm:$0xff] }
 0x3bf   : > { %v4611_v56 = vmul.f32 %v1919_v40, %v4266_v49  ;;  %v4888_v8 = vld [vmem:[#allocation36_spill] sm:$0xff] }
 0x3c0   : > { %v2907_v34 = vpack.c.bf16 %v2089_v4, %v2088_v15  ;;  %v2947_v17 = vpack.c.bf16 %v2105_v20, %v2104_v31  ;;  %v2987_v38 = vpack.c.bf16 %v2121_v58, %v2120_v9  ;;  %v4885_v15 = vld [vmem:[#allocation37_spill] sm:$0xff]  ;;  %v4886_v9 = vld [vmem:[#allocation19_spill] sm:$0xff] }
 0x3c1   : > { %v1922_v36 = vpop.f32.mrb[52].mxu1 }
 0x3c2   : > { %3014 = vst [vmem:[%s4535_s17 + $0x20] sm:$0xff] %v2907_v34   ;;  %3022 = vst [vmem:[%s4535_s17 + $0x60] sm:$0xff] %v2947_v17   ;;  %v1923_v12 = vadd.f32 %v1922_v36, %v4514_v55  ;;  %v1924_v11 = vpop.f32.mrb[53].mxu1 }
 0x3c3   : > { %3030 = vst [vmem:[%s4535_s17 + $0xa0] sm:$0xff] %v2987_v38   ;;  %v1925_v6 = vadd.f32 %v1924_v11, %v4516_v5  ;;  %v1926_v44 = vpop.f32.mrb[54].mxu1 }
 0x3c4   : > { %v2090_v62 = vmul.f32 %v1923_v12, %v4878_v57  ;;  %v2106_v49 = vmul.f32 %v1923_v12, %v4879_v7  ;;  %v2122_v19 = vmul.f32 %v1923_v12, %v4272_v25  ;;  %v1927_v22 = vadd.f32 %v1926_v44, %v4514_v55  ;;  %v1928_v2 = vpop.f32.mrb[55].mxu1  ;;  %v4890_v44 = vld [vmem:[#allocation20_spill] sm:$0xff] }
 0x3c5   : > { %v4623_v32 = vmul.f32 %v1925_v6, %v4288_v23  ;;  %v1929_v1 = vadd.f32 %v1928_v2, %v4516_v5 }
 0x3c6   : > { %v2091_v54 = vmul.f32 %v1927_v22, %v4880_v3  ;;  %v2107_v41 = vmul.f32 %v1927_v22, %v4881_v37  ;;  %v2123_v43 = vmul.f32 %v1927_v22, %v4277_v51  ;;  %v4883_v51 = vld [vmem:[#allocation30_spill] sm:$0xff]  ;;  %v4894_v37 = vld [vmem:[#allocation21_spill] sm:$0xff] }
 0x3c7   : > { %v4630_v63 = vmul.f32 %v1929_v1, %v4298_v27  ;;  %v4893_v1 = vld [vmem:[#allocation41_spill] sm:$0xff] }
 0x3c8   : > { %v2912_v26 = vpack.c.bf16 %v2091_v54, %v2090_v62  ;;  %v2952_v53 = vpack.c.bf16 %v2107_v41, %v2106_v49  ;;  %v2992_v25 = vpack.c.bf16 %v2123_v43, %v2122_v19  ;;  %v4891_v62 = vld [vmem:[#allocation32_spill] sm:$0xff]  ;;  %v4892_v49 = vld [vmem:[#allocation39_spill] sm:$0xff]  ;;  %v4895_v43 = vld [vmem:[#allocation33_spill] sm:$0xff] }
 0x3c9   : > { %v1932_v24 = vpop.f32.mrb[56].mxu1 }
 0x3ca   : > { %3015 = vst [vmem:[%s4535_s17 + $0x28] sm:$0xff] %v2912_v26   ;;  %3023 = vst [vmem:[%s4535_s17 + $0x68] sm:$0xff] %v2952_v53   ;;  %v1933_v23 = vadd.f32 %v1932_v24, %v4514_v55  ;;  %v1934_v59 = vpop.f32.mrb[57].mxu1  ;;  %v4896_v53 = vld [vmem:[#allocation40_spill] sm:$0xff]  ;;  %v4897_v24 = vld [vmem:[#allocation42_spill] sm:$0xff] }
 0x3cb   : > { %3031 = vst [vmem:[%s4535_s17 + $0xa8] sm:$0xff] %v2992_v25   ;;  %v1935_v46 = vadd.f32 %v1934_v59, %v4516_v5  ;;  %v1936_v47 = vpop.f32.mrb[58].mxu1 }
 0x3cc   : > { %v2092_v13 = vmul.f32 %v1933_v23, %v4882_v50  ;;  %v2108_v27 = vmul.f32 %v1933_v23, %v4883_v51  ;;  %v2124_v33 = vmul.f32 %v1933_v23, %v4884_v60  ;;  %v1937_v16 = vadd.f32 %v1936_v47, %v4514_v55  ;;  %v1938_v29 = vpop.f32.mrb[59].mxu1 }
 0x3cd   : > { %v4642_v61 = vmul.f32 %v1935_v46, %v4885_v15  ;;  %v1939_v31 = vadd.f32 %v1938_v29, %v4516_v5 }
 0x3ce   : > { %v2093_v10 = vmul.f32 %v1937_v16, %v4886_v9  ;;  %v2109_v40 = vmul.f32 %v1937_v16, %v4887_v18  ;;  %v2125_v4 = vmul.f32 %v1937_v16, %v4888_v8 }
 0x3cf   : > { %v4649_v20 = vmul.f32 %v1939_v31, %v4889_v21 }
 0x3d0   : > { %v2917_v58 = vpack.c.bf16 %v2093_v10, %v2092_v13  ;;  %v2957_v34 = vpack.c.bf16 %v2109_v40, %v2108_v27  ;;  %v2997_v17 = vpack.c.bf16 %v2125_v4, %v2124_v33 }
 0x3d1   : > { %v1942_v38 = vpop.f32.mrb[60].mxu1 }
 0x3d2   : > { %3016 = vst [vmem:[%s4535_s17 + $0x30] sm:$0xff] %v2917_v58   ;;  %3024 = vst [vmem:[%s4535_s17 + $0x70] sm:$0xff] %v2957_v34   ;;  %v1943_v36 = vadd.f32 %v1942_v38, %v4514_v55  ;;  %v1944_v12 = vpop.f32.mrb[61].mxu1 }
 0x3d3   : > { %3032 = vst [vmem:[%s4535_s17 + $0xb0] sm:$0xff] %v2997_v17   ;;  %v1945_v11 = vadd.f32 %v1944_v12, %v4516_v5  ;;  %v1946_v6 = vpop.f32.mrb[62].mxu1 }
 0x3d4   : > { %v2094_v57 = vmul.f32 %v1943_v36, %v4890_v44  ;;  %v2110_v7 = vmul.f32 %v1943_v36, %v4891_v62  ;;  %v2126_v19 = vmul.f32 %v1943_v36, %v4892_v49  ;;  %v1947_v22 = vadd.f32 %v1946_v6, %v4514_v55  ;;  %v1948_v2 = vpop.f32.mrb[63].mxu1 }
 0x3d5   : > { %v4661_v3 = vmul.f32 %v1945_v11, %v4893_v1  ;;  %v1949_v54 = vadd.f32 %v1948_v2, %v4516_v5 }
 0x3d6   : > { %v2095_v41 = vmul.f32 %v1947_v22, %v4894_v37  ;;  %v2111_v26 = vmul.f32 %v1947_v22, %v4895_v43  ;;  %v2127_v25 = vmul.f32 %v1947_v22, %v4896_v53 }
 0x3d7   : > { %v4668_v23 = vmul.f32 %v1949_v54, %v4897_v24 }
 0x3d8   : > { %v2922_v59 = vpack.c.bf16 %v2095_v41, %v2094_v57  ;;  %v2962_v46 = vpack.c.bf16 %v2111_v26, %v2110_v7  ;;  %v3002_v47 = vpack.c.bf16 %v2127_v25, %v2126_v19 }
 0x3d9   : > { %v3132_v55 = vpop.f32.mrb[64].mxu1 }
 0x3da   : > { %3017 = vst [vmem:[%s4535_s17 + $0x38] sm:$0xff] %v2922_v59   ;;  %3025 = vst [vmem:[%s4535_s17 + $0x78] sm:$0xff] %v2962_v46   ;;  %v1994_v50 = vadd.f32 %v3132_v55, %v4512_v0  ;;  %v1985_v5 = vpop.f32.mrb[65].mxu1 }
 0x3db   : > { %3033 = vst [vmem:[%s4535_s17 + $0xb8] sm:$0xff] %v3002_v47   ;;  %v1986_v13 = vadd.f32 %v1985_v5, %v4512_v0  ;;  %v3133_v51 = vpop.f32.mrb[66].mxu1 }
 0x3dc   : > { %v2066_v27 = vadd.f32 %v4547_v30, %v1994_v50  ;;  %v1997_v60 = vadd.f32 %v3133_v51, %v4512_v0  ;;  %v1988_v33 = vpop.f32.mrb[67].mxu1 }
 0x3dd   : > { %v2064_v16 = vadd.f32 %v4526_v39, %v1986_v13  ;;  %v1989_v29 = vadd.f32 %v1988_v33, %v4512_v0 }
 0x3de   : > { %v2067_v15 = vadd.f32 %v4554_v45, %v1997_v60 }
 0x3df   : > { %v2065_v31 = vadd.f32 %v4533_v14, %v1989_v29 }
 0x3e0   : > { %v2852_v9 = vpack.c.bf16 %v2067_v15, %v2066_v27 }
 0x3e1   : > { %v2847_v10 = vpack.c.bf16 %v2065_v31, %v2064_v16  ;;  %v3136_v18 = vpop.f32.mrb[68].mxu1 }
 0x3e2   : > { %3004 = vst [vmem:[%s4682_s24 + $0x8] sm:$0xff] %v2852_v9   ;;  %v2010_v30 = vadd.f32 %v3136_v18, %v4512_v0  ;;  %v2001_v40 = vpop.f32.mrb[69].mxu1 }
 0x3e3   : > { %2848 = vst [vmem:[%s4682_s24] sm:$0xff] %v2847_v10   ;;  %v2002_v39 = vadd.f32 %v2001_v40, %v4512_v0  ;;  %v3137_v8 = vpop.f32.mrb[70].mxu1 }
 0x3e4   : > { %v2070_v45 = vadd.f32 %v4585_v28, %v2010_v30  ;;  %v2013_v14 = vadd.f32 %v3137_v8, %v4512_v0  ;;  %v2004_v4 = vpop.f32.mrb[71].mxu1 }
 0x3e5   : > { %v2068_v21 = vadd.f32 %v4566_v35, %v2002_v39  ;;  %v2005_v58 = vadd.f32 %v2004_v4, %v4512_v0 }
 0x3e6   : > { %v2071_v34 = vadd.f32 %v4592_v42, %v2013_v14 }
 0x3e7   : > { %v2069_v17 = vadd.f32 %v4573_v52, %v2005_v58 }
 0x3e8   : > { %v2862_v38 = vpack.c.bf16 %v2071_v34, %v2070_v45 }
 0x3e9   : > { %v2857_v36 = vpack.c.bf16 %v2069_v17, %v2068_v21  ;;  %v3140_v12 = vpop.f32.mrb[72].mxu1 }
 0x3ea   : > { %3006 = vst [vmem:[%s4682_s24 + $0x18] sm:$0xff] %v2862_v38   ;;  %v2026_v11 = vadd.f32 %v3140_v12, %v4512_v0  ;;  %v2017_v6 = vpop.f32.mrb[73].mxu1 }
 0x3eb   : > { %3005 = vst [vmem:[%s4682_s24 + $0x10] sm:$0xff] %v2857_v36   ;;  %v2018_v28 = vadd.f32 %v2017_v6, %v4512_v0  ;;  %v3141_v44 = vpop.f32.mrb[74].mxu1 }
 0x3ec   : > { %v2074_v35 = vadd.f32 %v4623_v32, %v2026_v11  ;;  %v2029_v57 = vadd.f32 %v3141_v44, %v4512_v0  ;;  %v2020_v42 = vpop.f32.mrb[75].mxu1 }
 0x3ed   : > { %v2072_v52 = vadd.f32 %v4604_v48, %v2018_v28  ;;  %v2021_v62 = vadd.f32 %v2020_v42, %v4512_v0 }
 0x3ee   : > { %v2075_v7 = vadd.f32 %v4630_v63, %v2029_v57 }
 0x3ef   : > { %v2073_v49 = vadd.f32 %v4611_v56, %v2021_v62 }
 0x3f0   : > { %v2872_v19 = vpack.c.bf16 %v2075_v7, %v2074_v35 }
 0x3f1   : > { %v2867_v22 = vpack.c.bf16 %v2073_v49, %v2072_v52  ;;  %v3144_v2 = vpop.f32.mrb[76].mxu1 }
 0x3f2   : > { %3008 = vst [vmem:[%s4682_s24 + $0x28] sm:$0xff] %v2872_v19   ;;  %v2042_v32 = vadd.f32 %v3144_v2, %v4512_v0  ;;  %v2033_v1 = vpop.f32.mrb[77].mxu1 }
 0x3f3   : > { %3007 = vst [vmem:[%s4682_s24 + $0x20] sm:$0xff] %v2867_v22   ;;  %v2034_v48 = vadd.f32 %v2033_v1, %v4512_v0  ;;  %v3145_v54 = vpop.f32.mrb[78].mxu1 }
 0x3f4   : > { %v2078_v63 = vadd.f32 %v4661_v3, %v2042_v32  ;;  %v2045_v56 = vadd.f32 %v3145_v54, %v4512_v0  ;;  %v2036_v37 = vpop.f32.mrb[79].mxu1 }
 0x3f5   : > { %v2076_v41 = vadd.f32 %v4642_v61, %v2034_v48  ;;  %v2037_v43 = vadd.f32 %v2036_v37, %v4512_v0 }
 0x3f6   : > { %v2079_v26 = vadd.f32 %v4668_v23, %v2045_v56 }
 0x3f7   : > { %v2077_v53 = vadd.f32 %v4649_v20, %v2037_v43 }
 0x3f8   : > { %v2882_v25 = vpack.c.bf16 %v2079_v26, %v2078_v63 }
 0x3f9   : > { %v2877_v61 = vpack.c.bf16 %v2077_v53, %v2076_v41 }
 0x3fa   : > { %3010 = vst [vmem:[%s4682_s24 + $0x38] sm:$0xff] %v2882_v25  }
 0x3fb   : > { %3009 = vst [vmem:[%s4682_s24 + $0x30] sm:$0xff] %v2877_v61  }
 0x3fc   : > { %3390 = shalt.err (!%p3387_p7)
}
 0x3fd   : > { %s3391_s24 = scalar_lea.hbm %s4721_s23, 1024  ;;  %s3395_s12 = scalar_lea.hbm %s4796_s7, 4096 }
 0x3fe   : > { %p3392_p9 = scmp.ne.s32.totalorder %s4721_s23, %s3391_s24  ;;  %p3396_p12 = scmp.lt.u32.totalorder %s4721_s23, %s4796_s7 }
 0x3ff   : > { %p3397_p13 = scmp.lt.u32.totalorder %s3395_s12, %s3391_s24  ;;  %p3399_p1 = scmp.lt.u32.totalorder %s3391_s24, %s4721_s23 }
 0x400   : > { %p3393_p10 = pnand %p3392_p9, %p3540_p6 }
 0x401   : > { %p3398_p0 = por %p3397_p13, %p3396_p12 }
 0x402   : > { %p3394_p11 = pneg %p3393_p10 }
 0x403   : > { %p3400_p2 = por %p3399_p1, %p3398_p0 }
 0x405   : > { %p3401_p3 = pnand %p3400_p2, %p3394_p11 }
 0x407   : > { %3404 = shalt.err (!%p3401_p3)
}
 0x408   : > { %s3447_s10 = smov 64   ;;  %s3448_s18 = smov 4  }
 0x409   : > { %3149 = dma.vmem_to_hbm [thread:$0]  (%p3540_p6), %s4723_s20, 1024, %s4721_s23, %s2449_s25, %s3447_s10, %s3447_s10, %s3448_s18  }
 0x40a   : > { %s2454_s21 = scalar_lea.sflag [#allocation6], %s3660_s26 }
 0x40b   : > { %s4898_s19 = sshll.u32 %s3522_s9, 10  ;;  %s2499_s13 = sshll.u32 %s4535_s17, 4  ;;  %s2500_s13 = int_to_ptr.vmem [resolvable:$true] %s2499_s13 }
 0x40c   : > { %s2482_s24 = scalar_lea.hbm %s4797_s8, %s4898_s19  ;;  %s3449_s0 = smov 1024  }
 0x40d   : > { %3150 = sst [smem:[#allocation8]] (%p3540_p6), %s3449_s0  ;;  %s3450_s26 = smov 4096  }
 0x40e   : > { %3151 = sst [smem:[#allocation8 + $0x1]] (%p3540_p6), %s3450_s26  ;;  %s3451_s9 = smov 16  }
 0x40f   : > { %3152 = sst [smem:[#allocation8 + $0x2]] (%p3540_p6), %s3451_s9  ;;  %s3452_s20 = smov 64  }
 0x410   : > { %3153 = sst [smem:[#allocation8 + $0x3]] (%p3540_p6), %s3452_s20  ;;  %s3453_s23 = smov 4  }
 0x411   : > { %3154 = sst [smem:[#allocation8 + $0x4]] (%p3540_p6), %s3452_s20  ;;  %s3454_s25 = smov [#allocation7]  }
 0x412   : > { %3155 = sst [smem:[#allocation8 + $0x5]] (%p3540_p6), %s3453_s23  ;;  %s3455_s17 = smov 0  }
 0x413   : > { %3156 = dma.general (%p3540_p6), %s2500_s13, 3072, %s2482_s24, %s2454_s21, %s3454_s25, [#allocation8], %s3455_s17, 0  }
 0x414 PF: > { %p3166_p4 = scmp.ge.s32.totalorder %s3443_s30, 2  ;;  %s2527_s0 = sand.u32 1, %s3431_s27  }
 0x415   : > { %s2528_s10 = scalar_lea.sflag [#allocation4], %s2527_s0 }
 0x416   : > { %p3160_p5 = pnand %p3166_p4, %p3544_p8 }
 0x418   : > { %3422 = dma.done.wait (!%p3160_p5), %s2528_s10, 1024  }
 0x419   : > { %3424 = vsyncadd (!%p3160_p5), %s2528_s10, 4294966272  ;;  %s2537_s18 = scalar_lea.sflag [#allocation6], %s2527_s0 }
 0x41a   : > { %3426 = dma.done.wait (!%p3160_p5), %s2537_s18, 3072  }
 0x41b   : > { %3428 = vsyncadd (!%p3160_p5), %s2537_s18, 4294964224  ;;  %p22_p6 = scmp.ge.s32.totalorder %s3526_s11, 6   ;;  %s4899_s27 = smov %s3435_s28 }
 0x41c   : > { %s4900_s28 = smov %s3439_s29  ;;  %s4901_s29 = smov %s3538_s14 }
 0x41d   : > { %s4902_s30 = smov %s3526_s11  ;;  %24 = sbr.rel (!%p22_p6) target bundleno = 7 (0x7), region = 151 }
 0x424   :  { %2542 = vsyncpa [#allocation4], 1 }
 0x425   :  { %2544 = vsyncpa [#allocation4 + $0x1], 1 }
 0x426   :  { %2545 = vsyncpa [#allocation6], 1 }
 0x427   :  { %2547 = vsyncpa [#allocation6 + $0x1], 1 }

</bundles_post_ra>
